<compile_context>
chip_gen: v7x
topology: tpu7x:2x2x1
jax: 0.10.0
libtpu: 0.0.40
codegen_flags: <defaults>
</compile_context>

<pallas_src>
import numpy as np
import jax
import jax.numpy as jnp
from jax.experimental import pallas as pl
from jax.experimental.pallas import tpu as pltpu

# ----------------------------- configuration -------------------------------
BATCH       = 4           # total batch (streamed over the grid)
PB          = 2           # samples per grid step (128 lanes)  -- 4 on v6e/v7x
NUM_LAYERS  = 2
LAYER_SIZE  = 64          # L
NUM_CLASSES = 10
CLASS_PAD   = 64          # classes padded so PB*CLASS_PAD is lane-dense
WAVELENGTH  = 0.75e-3
PIXEL_SIZE  = 0.4e-3
DISTANCE    = 0.03

L  = LAYER_SIZE
NL = NUM_LAYERS
CP = CLASS_PAD
BL = PB * L               # 128  (per-step batch fused along lanes)
BC = PB * CP              # 128  (per-step padded class lanes)


# ------------------------------- kernel ------------------------------------
def d2nn_kernel(x_ref, seg_ref, cos_ref, sin_ref, hr_ref, hi_ref,
                wb_ref, wdt_ref, vb_ref, vdt_ref, vmask_ref, umask_ref,
                out_ref, fields_ref=None):
    f32 = jnp.float32
    bf16 = jnp.bfloat16

    def mxu(a, b):                       # bf16 in, f32 accumulate
        return jnp.dot(a.astype(bf16), b.astype(bf16),
                       preferred_element_type=f32)

    # ---- per-sample L2 normalisation:  x_b / (||x_b||_2 + 1e-6) ----
    # row-sum first (cheap), then a tiny segment-sum dot that broadcasts each
    # sample's lane-block total back onto its own lanes.
    x = x_ref[...]                                            # (L, BL) f32
    sq_row = jnp.sum(x * x, axis=0, keepdims=True)            # (1, BL)
    tot = mxu(sq_row, seg_ref[...])                           # (1, BL)
    inv = 1.0 / (jnp.sqrt(tot) + 1e-6)
    fr = x * inv                                              # real field
    if fields_ref is not None:                                # imag == 0 at input
        fields_ref[0, :L, :] = fr
        fields_ref[0, L:, :] = jnp.zeros_like(fr)

    fi = None
    for l in range(NL):
        # ---- phase mask: field *= exp(i*phase_l) (cos/sin precomputed) ----
        cr = cos_ref[l]                                       # (L, BL)
        ci = sin_ref[l]
        if l == 0:                                            # input is real
            ar = fr * cr
            ai = fr * ci
        else:
            ar = fr * cr - fi * ci
            ai = fr * ci + fi * cr

        # ---- FFT2 = W @ A @ W  (block-real, batch-fused, bf16 MXU) ----
        ts = mxu(wb_ref[...], jnp.concatenate([ar, ai], axis=0))            # (2L, BL)
        gc = mxu(jnp.concatenate([ts[:L], ts[L:]], axis=1), wdt_ref[...])   # (L, 2BL)
        gr = gc[:, :BL]
        gi = gc[:, BL:]

        # ---- angular-spectrum transfer function multiply ----
        hr = hr_ref[...]
        hi = hi_ref[...]
        g2r = gr * hr - gi * hi
        g2i = gr * hi + gi * hr

        # ---- IFFT2 = V @ G2 @ V ----
        us = mxu(vb_ref[...], jnp.concatenate([g2r, g2i], axis=0))          # (2L, BL)
        fc = mxu(jnp.concatenate([us[:L], us[L:]], axis=1), vdt_ref[...])   # (L, 2BL)
        fr = fc[:, :BL]
        fi = fc[:, BL:]

        if fields_ref is not None:                    # two direct half-slab stores
            fields_ref[l + 1, :L, :] = fr
            fields_ref[l + 1, L:, :] = fi

    # ---- detector energies: masks are separable rectangles u_c (x) v_c ----
    inten = fr * fr + fi * fi                                 # (L, BL)
    s = mxu(inten, vmask_ref[...])                            # (L, BC)   MXU
    out_ref[...] = jnp.sum(umask_ref[...] * s, axis=0, keepdims=True)   # (1, BC)

    # TODO(synk): torch.isnan(...).any() -> raise has no in-kernel equivalent
    # (would need pl.debug_check under enable_debug_checks); the guard is
    # applied host-side on the returned fields in the wrapper/main instead.


# ------------------------------- wrapper ------------------------------------
def d2nn_forward(x, ops, *, return_fields=True):
    (seg, cosp, sinp, hr_t, hi_t, wb, wdt, vb, vdt, vmask, umask) = ops

    BT = x.shape[0]
    assert BT % PB == 0
    NB = BT // PB                                # batch blocks = grid steps

    # layout plumbing (wrapper side): NCHW -> (L, BT*L), samples along lanes
    x_cat = jnp.transpose(x[:, 0], (1, 0, 2)).reshape(L, BT * L)

    def const(shape):
        n = len(shape)
        return pl.BlockSpec(shape, lambda i, _n=n: (0,) * _n)   # same block
                                                                # every step ->
                                                                # fetched once,
                                                                # VMEM-resident
    in_specs = [
        pl.BlockSpec((L, BL), lambda i: (0, i)),   # x : streamed per batch block
        const((BL, BL)),                           # seg
        const((NL, L, BL)),                        # cos(phase) tiled over PB
        const((NL, L, BL)),                        # sin(phase) tiled over PB
        const((L, BL)),                            # Hr tiled
        const((L, BL)),                            # Hi tiled
        const((2 * L, 2 * L)),                     # Wb   (128,128) bf16
        const((2 * BL, 2 * BL)),                   # WdT  (256,256) bf16
        const((2 * L, 2 * L)),                     # Vb
        const((2 * BL, 2 * BL)),                   # VdT
        const((BL, BC)),                           # vmask (blockdiag over PB)
        const((L, BC)),                            # umask (tiled over PB)
    ]

    out_specs = [pl.BlockSpec((1, BC), lambda i: (0, i))]
    out_shapes = [jax.ShapeDtypeStruct((1, BT * CP), jnp.float32)]
    if return_fields:
        out_specs.append(pl.BlockSpec((NL + 1, 2 * L, BL), lambda i: (0, 0, i)))
        out_shapes.append(jax.ShapeDtypeStruct((NL + 1, 2 * L, BT * L), jnp.float32))

    grid_spec = pltpu.PrefetchScalarGridSpec(
        num_scalar_prefetch=0,
        grid=(NB,),                                # batch on the grid
        in_specs=in_specs,
        out_specs=tuple(out_specs),
    )

    # advisory cost so XLA overlaps the call with surrounding plumbing
    flops_step = (2 * NL * (2 * (2 * L) * (2 * L) * BL)          # left dots
                  + 2 * NL * (2 * L * (2 * BL) * (2 * BL))       # right dots
                  + 2 * BL * BL                                  # norm dot
                  + 2 * L * BL * BC)                             # detector dot
    bytes_in = sum(int(a.size) * a.dtype.itemsize for a in
                   (x_cat, seg, cosp, sinp, hr_t, hi_t,
                    wb, wdt, vb, vdt, vmask, umask))
    bytes_out = sum(int(np.prod(s.shape)) * 4 for s in out_shapes)
    cost = pl.CostEstimate(flops=int(NB * flops_step), transcendentals=0,
                           bytes_accessed=int(bytes_in + bytes_out))

    outs = pl.pallas_call(
        d2nn_kernel,
        out_shape=tuple(out_shapes),
        grid_spec=grid_spec,
        compiler_params=pltpu.CompilerParams(
            dimension_semantics=("parallel",)),    # v7x: shard blocks on 2 TCs
        cost_estimate=cost,
    )(x_cat, seg, cosp, sinp, hr_t, hi_t, wb, wdt, vb, vdt, vmask, umask)

    energies = outs[0].reshape(BT, CP)[:, :NUM_CLASSES]          # (BT, C)
    if not return_fields:
        return energies

    fields_cat = outs[1]                                         # (NL+1, 2L, BT*L)
    fields_r = fields_cat[:, :L, :].reshape(NL + 1, L, BT, L).transpose(2, 0, 1, 3)
    fields_i = fields_cat[:, L:, :].reshape(NL + 1, L, BT, L).transpose(2, 0, 1, 3)
    return energies, fields_r, fields_i


# -------------------------- parameter construction --------------------------
def make_params(key):
    # phase masks ~ U(0, 2*pi)
    phase = jax.random.uniform(key, (NL, L, L), jnp.float32,
                               minval=0.0, maxval=2.0 * np.pi)

    # angular-spectrum transfer function H (same for every layer)
    k = 2.0 * np.pi / WAVELENGTH
    fx = np.fft.fftfreq(L, d=PIXEL_SIZE)
    FX, FY = np.meshgrid(fx, fx, indexing="ij")
    kx = 2.0 * np.pi * FX
    ky = 2.0 * np.pi * FY
    kz = np.sqrt((k ** 2 - kx ** 2 - ky ** 2).astype(np.complex128))
    kz = np.where(kz.imag == 0, kz, 0.0)          # zero-out evanescent modes
    H = np.exp(1j * kz * DISTANCE)
    Hr = np.asarray(H.real, np.float32)
    Hi = np.asarray(H.imag, np.float32)

    # separable detector indicators: mask_c = Um[:,c] (outer) Vm[:,c]
    # (reproduces PyTorch slice clamping: OOB -> empty -> all zero)
    det = L // 4
    Um = np.zeros((L, CP), np.float32)
    Vm = np.zeros((L, CP), np.float32)
    for i in range(NUM_CLASSES):
        row, col = i // 5, i % 5
        ys, xs = row * det + 25, col * det + 25
        ye, xe = ys + det, xs + det
        ys_c, ye_c = max(0, min(ys, L)), max(0, min(ye, L))
        xs_c, xe_c = max(0, min(xs, L)), max(0, min(xe, L))
        if ye_c > ys_c and xe_c > xs_c:
            Um[ys_c:ye_c, i] = 1.0
            Vm[xs_c:xe_c, i] = 1.0
    return phase, Hr, Hi, Um, Vm


def build_kernel_operands(phase, Hr, Hi, Um, Vm):
    # (symmetric) DFT / IDFT matrices
    n = np.arange(L)
    W = np.exp(-2j * np.pi * np.outer(n, n) / L)
    V = np.conj(W) / L
    Wr, Wi = W.real.astype(np.float32), W.imag.astype(np.float32)
    Vr, Vi = V.real.astype(np.float32), V.imag.astype(np.float32)

    def left_block(mr, mi):            # Mb @ [Ar; Ai] = [Re(M@A); Im(M@A)]
        return np.block([[mr, -mi], [mi, mr]]).astype(np.float32)

    def right_block(mr, mi):           # [Tr|Ti] @ MbT = [Re(T@M)|Im(T@M)], batched
        eye = np.eye(PB, dtype=np.float32)
        dr = np.kron(eye, mr)
        di = np.kron(eye, mi)
        return np.block([[dr, di], [-di, dr]]).astype(np.float32)

    wb  = left_block(Wr, Wi)           # (128, 128)
    vb  = left_block(Vr, Vi)
    wdt = right_block(Wr, Wi)          # (256, 256)
    vdt = right_block(Vr, Vi)

    # per-sample L2 norm via one tiny MXU dot
    seg = np.kron(np.eye(PB, dtype=np.float32), np.ones((L, L), np.float32))

    # grid-invariant transcendentals done on the host, tiled over per-step batch
    ph = np.asarray(phase)
    cosp = np.tile(np.cos(ph), (1, 1, PB)).astype(np.float32)   # (NL, L, BL)
    sinp = np.tile(np.sin(ph), (1, 1, PB)).astype(np.float32)

    hr_t = np.tile(Hr, (1, PB)).astype(np.float32)              # (L, BL)
    hi_t = np.tile(Hi, (1, PB)).astype(np.float32)

    # detector-reduction operands
    vmask = np.kron(np.eye(PB, dtype=np.float32), Vm)           # (BL, BC)
    umask = np.tile(Um, (1, PB)).astype(np.float32)             # (L,  BC)

    bf = lambda a: jnp.asarray(a, jnp.bfloat16)   # MXU operands -> bf16
    fj = lambda a: jnp.asarray(a, jnp.float32)
    return (bf(seg), fj(cosp), fj(sinp), fj(hr_t), fj(hi_t),
            bf(wb), bf(wdt), bf(vb), bf(vdt), bf(vmask), fj(umask))


# --------------------------- pure-JAX reference ------------------------------
def reference_forward(x, phase, Hr, Hi, Um, Vm):
    H = jnp.asarray(Hr).astype(jnp.complex64) + 1j * jnp.asarray(Hi).astype(jnp.complex64)
    nrm = jnp.sqrt(jnp.sum(x * x, axis=(2, 3), keepdims=True)) + 1e-6
    field = (x / nrm)[:, 0].astype(jnp.complex64)
    for l in range(NL):
        field = field * jnp.exp(1j * phase[l].astype(jnp.complex64))
        field = jnp.fft.ifft2(jnp.fft.fft2(field) * H)
    intensity = jnp.abs(field) ** 2
    masks = jnp.einsum('rc,xc->crx', jnp.asarray(Um), jnp.asarray(Vm))[:NUM_CLASSES]
    energies = jnp.sum(masks[None] * intensity[:, None], axis=(2, 3))
    return energies, field


# ---------------------------------- main -------------------------------------
if __name__ == "__main__":
    key = jax.random.PRNGKey(0)
    k_x, k_phase = jax.random.split(key)

    # deterministic example input (NCHW)
    x = jax.random.uniform(k_x, (BATCH, 1, L, L), jnp.float32)

    phase, Hr, Hi, Um, Vm = make_params(k_phase)
    ops = build_kernel_operands(phase, Hr, Hi, Um, Vm)

    # energies-only path (skips the per-layer field HBM writeback entirely)
    energies_fast = d2nn_forward(x, ops, return_fields=False)

    # full path (per-layer propagated fields = the module's actual output)
    energies, fields_r, fields_i = d2nn_forward(x, ops, return_fields=True)
    jax.block_until_ready((energies_fast, energies, fields_r, fields_i))

    # module's NaN guard, applied host-side on the propagated fields
    if np.isnan(np.asarray(fields_r)).any() or np.isnan(np.asarray(fields_i)).any():
        raise ValueError("NaN detected in propagation")

    # sanity-check against a jnp.fft reference (bf16-MXU DFT -> generous tol)
    ref_e, ref_f = reference_forward(x, phase, Hr, Hi, Um, Vm)
    np.testing.assert_allclose(np.asarray(energies), np.asarray(ref_e),
                               rtol=5e-2, atol=1e-4)
    np.testing.assert_allclose(np.asarray(energies_fast), np.asarray(energies),
                               rtol=1e-6, atol=1e-7)
    np.testing.assert_allclose(np.asarray(fields_r[:, NL]), np.asarray(ref_f.real),
                               rtol=5e-2, atol=5e-3)
    np.testing.assert_allclose(np.asarray(fields_i[:, NL]), np.asarray(ref_f.imag),
                               rtol=5e-2, atol=5e-3)

    print("KERNEL_OK")
</pallas_src>

<mosaic_0001>
module attributes {stable_mosaic.version = 11 : i64} {
  func.func @d2nn_kernel(%arg0: i32, %arg1: memref<64x128xf32, #tpu.memory_space<vmem>>, %arg2: memref<128x128xbf16, #tpu.memory_space<vmem>>, %arg3: memref<2x64x128xf32, #tpu.memory_space<vmem>>, %arg4: memref<2x64x128xf32, #tpu.memory_space<vmem>>, %arg5: memref<64x128xf32, #tpu.memory_space<vmem>>, %arg6: memref<64x128xf32, #tpu.memory_space<vmem>>, %arg7: memref<128x128xbf16, #tpu.memory_space<vmem>>, %arg8: memref<256x256xbf16, #tpu.memory_space<vmem>>, %arg9: memref<128x128xbf16, #tpu.memory_space<vmem>>, %arg10: memref<256x256xbf16, #tpu.memory_space<vmem>>, %arg11: memref<128x128xbf16, #tpu.memory_space<vmem>>, %arg12: memref<64x128xf32, #tpu.memory_space<vmem>>, %arg13: memref<1x128xf32, #tpu.memory_space<vmem>>) attributes {dimension_semantics = [#tpu.dimension_semantics<parallel>], iteration_bounds = array<i64: 2>, scalar_prefetch = 0 : i64, scratch_operands = 0 : i64, tpu.core_type = #tpu.core_type<tc>, window_params = [{transform_indices = @transform_0, window_bounds = array<i64: 64, 128>}, {pipeline_mode = #tpu.pipeline_mode<synchronous>, transform_indices = @transform_1, window_bounds = array<i64: 128, 128>}, {pipeline_mode = #tpu.pipeline_mode<synchronous>, transform_indices = @transform_2, window_bounds = array<i64: 2, 64, 128>}, {pipeline_mode = #tpu.pipeline_mode<synchronous>, transform_indices = @transform_3, window_bounds = array<i64: 2, 64, 128>}, {pipeline_mode = #tpu.pipeline_mode<synchronous>, transform_indices = @transform_4, window_bounds = array<i64: 64, 128>}, {pipeline_mode = #tpu.pipeline_mode<synchronous>, transform_indices = @transform_5, window_bounds = array<i64: 64, 128>}, {pipeline_mode = #tpu.pipeline_mode<synchronous>, transform_indices = @transform_6, window_bounds = array<i64: 128, 128>}, {pipeline_mode = #tpu.pipeline_mode<synchronous>, transform_indices = @transform_7, window_bounds = array<i64: 256, 256>}, {pipeline_mode = #tpu.pipeline_mode<synchronous>, transform_indices = @transform_8, window_bounds = array<i64: 128, 128>}, {pipeline_mode = #tpu.pipeline_mode<synchronous>, transform_indices = @transform_9, window_bounds = array<i64: 256, 256>}, {pipeline_mode = #tpu.pipeline_mode<synchronous>, transform_indices = @transform_10, window_bounds = array<i64: 128, 128>}, {pipeline_mode = #tpu.pipeline_mode<synchronous>, transform_indices = @transform_11, window_bounds = array<i64: 64, 128>}, {transform_indices = @transform_12, window_bounds = array<i64: 1, 128>}]} {
    %c0 = arith.constant 0 : index
    %c0_0 = arith.constant 0 : index
    %0 = vector.load %arg1[%c0, %c0_0] : memref<64x128xf32, #tpu.memory_space<vmem>>, vector<64x128xf32>
    %1 = arith.mulf %0, %0 : vector<64x128xf32>
    %cst = arith.constant dense<0.000000e+00> : vector<128xf32>
    %2 = vector.multi_reduction <add>, %1, %cst [0] : vector<64x128xf32> to vector<128xf32>
    %3 = vector.shape_cast %2 : vector<128xf32> to vector<1x128xf32>
    %c0_1 = arith.constant 0 : index
    %c0_2 = arith.constant 0 : index
    %4 = vector.load %arg2[%c0_1, %c0_2] : memref<128x128xbf16, #tpu.memory_space<vmem>>, vector<128x128xbf16>
    %5 = arith.truncf %3 : vector<1x128xf32> to vector<1x128xbf16>
    %cst_3 = arith.constant dense<0.000000e+00> : vector<1x128xf32>
    %6 = tpu.matmul %5, %4, %cst_3 {dimension_numbers = #tpu.dot_dimension_numbers<[1], [0], [0], [1], [0, 0, 1, 1], [], []>} : vector<1x128xbf16>, vector<128x128xbf16>, vector<1x128xf32> -> vector<1x128xf32>
    %7 = math.sqrt %6 : vector<1x128xf32>
    %cst_4 = arith.constant 9.99999997E-7 : f32
    %8 = vector.broadcast %cst_4 : f32 to vector<1x128xf32>
    %9 = arith.addf %7, %8 : vector<1x128xf32>
    %cst_5 = arith.constant 1.000000e+00 : f32
    %10 = vector.broadcast %cst_5 : f32 to vector<1x128xf32>
    %11 = arith.divf %10, %9 : vector<1x128xf32>
    %12 = vector.broadcast %11 : vector<1x128xf32> to vector<64x128xf32>
    %13 = arith.mulf %0, %12 : vector<64x128xf32>
    %c0_6 = arith.constant 0 : index
    %c0_7 = arith.constant 0 : index
    %c0_8 = arith.constant 0 : index
    %14 = vector.load %arg3[%c0_6, %c0_7, %c0_8] : memref<2x64x128xf32, #tpu.memory_space<vmem>>, vector<1x64x128xf32>
    %15 = vector.shape_cast %14 : vector<1x64x128xf32> to vector<64x128xf32>
    %c0_9 = arith.constant 0 : index
    %c0_10 = arith.constant 0 : index
    %c0_11 = arith.constant 0 : index
    %16 = vector.load %arg4[%c0_9, %c0_10, %c0_11] : memref<2x64x128xf32, #tpu.memory_space<vmem>>, vector<1x64x128xf32>
    %17 = vector.shape_cast %16 : vector<1x64x128xf32> to vector<64x128xf32>
    %18 = arith.mulf %13, %15 : vector<64x128xf32>
    %19 = arith.mulf %13, %17 : vector<64x128xf32>
    %c0_12 = arith.constant 0 : index
    %c0_13 = arith.constant 0 : index
    %20 = vector.load %arg7[%c0_12, %c0_13] : memref<128x128xbf16, #tpu.memory_space<vmem>>, vector<128x128xbf16>
    %21 = tpu.concatenate %18, %19 in 0 : vector<64x128xf32>, vector<64x128xf32> -> vector<128x128xf32>
    %22 = arith.truncf %21 : vector<128x128xf32> to vector<128x128xbf16>
    %cst_14 = arith.constant dense<0.000000e+00> : vector<128x128xf32>
    %23 = tpu.matmul %20, %22, %cst_14 {dimension_numbers = #tpu.dot_dimension_numbers<[1], [0], [0], [1], [0, 0, 1, 1], [], []>} : vector<128x128xbf16>, vector<128x128xbf16>, vector<128x128xf32> -> vector<128x128xf32>
    %24 = vector.extract_strided_slice %23 {offsets = [0, 0], sizes = [64, 128], strides = [1, 1]} : vector<128x128xf32> to vector<64x128xf32>
    %25 = vector.extract_strided_slice %23 {offsets = [64, 0], sizes = [64, 128], strides = [1, 1]} : vector<128x128xf32> to vector<64x128xf32>
    %26 = tpu.concatenate %24, %25 in 1 : vector<64x128xf32>, vector<64x128xf32> -> vector<64x256xf32>
    %c0_15 = arith.constant 0 : index
    %c0_16 = arith.constant 0 : index
    %27 = vector.load %arg8[%c0_15, %c0_16] : memref<256x256xbf16, #tpu.memory_space<vmem>>, vector<256x256xbf16>
    %28 = arith.truncf %26 : vector<64x256xf32> to vector<64x256xbf16>
    %cst_17 = arith.constant dense<0.000000e+00> : vector<64x256xf32>
    %29 = tpu.matmul %28, %27, %cst_17 {dimension_numbers = #tpu.dot_dimension_numbers<[1], [0], [0], [1], [0, 0, 1, 1], [], []>} : vector<64x256xbf16>, vector<256x256xbf16>, vector<64x256xf32> -> vector<64x256xf32>
    %30 = vector.extract_strided_slice %29 {offsets = [0, 0], sizes = [64, 128], strides = [1, 1]} : vector<64x256xf32> to vector<64x128xf32>
    %31 = vector.extract_strided_slice %29 {offsets = [0, 128], sizes = [64, 128], strides = [1, 1]} : vector<64x256xf32> to vector<64x128xf32>
    %c0_18 = arith.constant 0 : index
    %c0_19 = arith.constant 0 : index
    %32 = vector.load %arg5[%c0_18, %c0_19] : memref<64x128xf32, #tpu.memory_space<vmem>>, vector<64x128xf32>
    %c0_20 = arith.constant 0 : index
    %c0_21 = arith.constant 0 : index
    %33 = vector.load %arg6[%c0_20, %c0_21] : memref<64x128xf32, #tpu.memory_space<vmem>>, vector<64x128xf32>
    %34 = arith.mulf %30, %32 : vector<64x128xf32>
    %35 = arith.mulf %31, %33 : vector<64x128xf32>
    %36 = arith.subf %34, %35 : vector<64x128xf32>
    %37 = arith.mulf %30, %33 : vector<64x128xf32>
    %38 = arith.mulf %31, %32 : vector<64x128xf32>
    %39 = arith.addf %37, %38 : vector<64x128xf32>
    %c0_22 = arith.constant 0 : index
    %c0_23 = arith.constant 0 : index
    %40 = vector.load %arg9[%c0_22, %c0_23] : memref<128x128xbf16, #tpu.memory_space<vmem>>, vector<128x128xbf16>
    %41 = tpu.concatenate %36, %39 in 0 : vector<64x128xf32>, vector<64x128xf32> -> vector<128x128xf32>
    %42 = arith.truncf %41 : vector<128x128xf32> to vector<128x128xbf16>
    %cst_24 = arith.constant dense<0.000000e+00> : vector<128x128xf32>
    %43 = tpu.matmul %40, %42, %cst_24 {dimension_numbers = #tpu.dot_dimension_numbers<[1], [0], [0], [1], [0, 0, 1, 1], [], []>} : vector<128x128xbf16>, vector<128x128xbf16>, vector<128x128xf32> -> vector<128x128xf32>
    %44 = vector.extract_strided_slice %43 {offsets = [0, 0], sizes = [64, 128], strides = [1, 1]} : vector<128x128xf32> to vector<64x128xf32>
    %45 = vector.extract_strided_slice %43 {offsets = [64, 0], sizes = [64, 128], strides = [1, 1]} : vector<128x128xf32> to vector<64x128xf32>
    %46 = tpu.concatenate %44, %45 in 1 : vector<64x128xf32>, vector<64x128xf32> -> vector<64x256xf32>
    %c0_25 = arith.constant 0 : index
    %c0_26 = arith.constant 0 : index
    %47 = vector.load %arg10[%c0_25, %c0_26] : memref<256x256xbf16, #tpu.memory_space<vmem>>, vector<256x256xbf16>
    %48 = arith.truncf %46 : vector<64x256xf32> to vector<64x256xbf16>
    %cst_27 = arith.constant dense<0.000000e+00> : vector<64x256xf32>
    %49 = tpu.matmul %48, %47, %cst_27 {dimension_numbers = #tpu.dot_dimension_numbers<[1], [0], [0], [1], [0, 0, 1, 1], [], []>} : vector<64x256xbf16>, vector<256x256xbf16>, vector<64x256xf32> -> vector<64x256xf32>
    %50 = vector.extract_strided_slice %49 {offsets = [0, 0], sizes = [64, 128], strides = [1, 1]} : vector<64x256xf32> to vector<64x128xf32>
    %51 = vector.extract_strided_slice %49 {offsets = [0, 128], sizes = [64, 128], strides = [1, 1]} : vector<64x256xf32> to vector<64x128xf32>
    %c1 = arith.constant 1 : index
    %c0_28 = arith.constant 0 : index
    %c0_29 = arith.constant 0 : index
    %52 = vector.load %arg3[%c1, %c0_28, %c0_29] : memref<2x64x128xf32, #tpu.memory_space<vmem>>, vector<1x64x128xf32>
    %53 = vector.shape_cast %52 : vector<1x64x128xf32> to vector<64x128xf32>
    %c1_30 = arith.constant 1 : index
    %c0_31 = arith.constant 0 : index
    %c0_32 = arith.constant 0 : index
    %54 = vector.load %arg4[%c1_30, %c0_31, %c0_32] : memref<2x64x128xf32, #tpu.memory_space<vmem>>, vector<1x64x128xf32>
    %55 = vector.shape_cast %54 : vector<1x64x128xf32> to vector<64x128xf32>
    %56 = arith.mulf %50, %53 : vector<64x128xf32>
    %57 = arith.mulf %51, %55 : vector<64x128xf32>
    %58 = arith.subf %56, %57 : vector<64x128xf32>
    %59 = arith.mulf %50, %55 : vector<64x128xf32>
    %60 = arith.mulf %51, %53 : vector<64x128xf32>
    %61 = arith.addf %59, %60 : vector<64x128xf32>
    %c0_33 = arith.constant 0 : index
    %c0_34 = arith.constant 0 : index
    %62 = vector.load %arg7[%c0_33, %c0_34] : memref<128x128xbf16, #tpu.memory_space<vmem>>, vector<128x128xbf16>
    %63 = tpu.concatenate %58, %61 in 0 : vector<64x128xf32>, vector<64x128xf32> -> vector<128x128xf32>
    %64 = arith.truncf %63 : vector<128x128xf32> to vector<128x128xbf16>
    %cst_35 = arith.constant dense<0.000000e+00> : vector<128x128xf32>
    %65 = tpu.matmul %62, %64, %cst_35 {dimension_numbers = #tpu.dot_dimension_numbers<[1], [0], [0], [1], [0, 0, 1, 1], [], []>} : vector<128x128xbf16>, vector<128x128xbf16>, vector<128x128xf32> -> vector<128x128xf32>
    %66 = vector.extract_strided_slice %65 {offsets = [0, 0], sizes = [64, 128], strides = [1, 1]} : vector<128x128xf32> to vector<64x128xf32>
    %67 = vector.extract_strided_slice %65 {offsets = [64, 0], sizes = [64, 128], strides = [1, 1]} : vector<128x128xf32> to vector<64x128xf32>
    %68 = tpu.concatenate %66, %67 in 1 : vector<64x128xf32>, vector<64x128xf32> -> vector<64x256xf32>
    %c0_36 = arith.constant 0 : index
    %c0_37 = arith.constant 0 : index
    %69 = vector.load %arg8[%c0_36, %c0_37] : memref<256x256xbf16, #tpu.memory_space<vmem>>, vector<256x256xbf16>
    %70 = arith.truncf %68 : vector<64x256xf32> to vector<64x256xbf16>
    %cst_38 = arith.constant dense<0.000000e+00> : vector<64x256xf32>
    %71 = tpu.matmul %70, %69, %cst_38 {dimension_numbers = #tpu.dot_dimension_numbers<[1], [0], [0], [1], [0, 0, 1, 1], [], []>} : vector<64x256xbf16>, vector<256x256xbf16>, vector<64x256xf32> -> vector<64x256xf32>
    %72 = vector.extract_strided_slice %71 {offsets = [0, 0], sizes = [64, 128], strides = [1, 1]} : vector<64x256xf32> to vector<64x128xf32>
    %73 = vector.extract_strided_slice %71 {offsets = [0, 128], sizes = [64, 128], strides = [1, 1]} : vector<64x256xf32> to vector<64x128xf32>
    %c0_39 = arith.constant 0 : index
    %c0_40 = arith.constant 0 : index
    %74 = vector.load %arg5[%c0_39, %c0_40] : memref<64x128xf32, #tpu.memory_space<vmem>>, vector<64x128xf32>
    %c0_41 = arith.constant 0 : index
    %c0_42 = arith.constant 0 : index
    %75 = vector.load %arg6[%c0_41, %c0_42] : memref<64x128xf32, #tpu.memory_space<vmem>>, vector<64x128xf32>
    %76 = arith.mulf %72, %74 : vector<64x128xf32>
    %77 = arith.mulf %73, %75 : vector<64x128xf32>
    %78 = arith.subf %76, %77 : vector<64x128xf32>
    %79 = arith.mulf %72, %75 : vector<64x128xf32>
    %80 = arith.mulf %73, %74 : vector<64x128xf32>
    %81 = arith.addf %79, %80 : vector<64x128xf32>
    %c0_43 = arith.constant 0 : index
    %c0_44 = arith.constant 0 : index
    %82 = vector.load %arg9[%c0_43, %c0_44] : memref<128x128xbf16, #tpu.memory_space<vmem>>, vector<128x128xbf16>
    %83 = tpu.concatenate %78, %81 in 0 : vector<64x128xf32>, vector<64x128xf32> -> vector<128x128xf32>
    %84 = arith.truncf %83 : vector<128x128xf32> to vector<128x128xbf16>
    %cst_45 = arith.constant dense<0.000000e+00> : vector<128x128xf32>
    %85 = tpu.matmul %82, %84, %cst_45 {dimension_numbers = #tpu.dot_dimension_numbers<[1], [0], [0], [1], [0, 0, 1, 1], [], []>} : vector<128x128xbf16>, vector<128x128xbf16>, vector<128x128xf32> -> vector<128x128xf32>
    %86 = vector.extract_strided_slice %85 {offsets = [0, 0], sizes = [64, 128], strides = [1, 1]} : vector<128x128xf32> to vector<64x128xf32>
    %87 = vector.extract_strided_slice %85 {offsets = [64, 0], sizes = [64, 128], strides = [1, 1]} : vector<128x128xf32> to vector<64x128xf32>
    %88 = tpu.concatenate %86, %87 in 1 : vector<64x128xf32>, vector<64x128xf32> -> vector<64x256xf32>
    %c0_46 = arith.constant 0 : index
    %c0_47 = arith.constant 0 : index
    %89 = vector.load %arg10[%c0_46, %c0_47] : memref<256x256xbf16, #tpu.memory_space<vmem>>, vector<256x256xbf16>
    %90 = arith.truncf %88 : vector<64x256xf32> to vector<64x256xbf16>
    %cst_48 = arith.constant dense<0.000000e+00> : vector<64x256xf32>
    %91 = tpu.matmul %90, %89, %cst_48 {dimension_numbers = #tpu.dot_dimension_numbers<[1], [0], [0], [1], [0, 0, 1, 1], [], []>} : vector<64x256xbf16>, vector<256x256xbf16>, vector<64x256xf32> -> vector<64x256xf32>
    %92 = vector.extract_strided_slice %91 {offsets = [0, 0], sizes = [64, 128], strides = [1, 1]} : vector<64x256xf32> to vector<64x128xf32>
    %93 = vector.extract_strided_slice %91 {offsets = [0, 128], sizes = [64, 128], strides = [1, 1]} : vector<64x256xf32> to vector<64x128xf32>
    %94 = arith.mulf %92, %92 : vector<64x128xf32>
    %95 = arith.mulf %93, %93 : vector<64x128xf32>
    %96 = arith.addf %94, %95 : vector<64x128xf32>
    %c0_49 = arith.constant 0 : index
    %c0_50 = arith.constant 0 : index
    %97 = vector.load %arg11[%c0_49, %c0_50] : memref<128x128xbf16, #tpu.memory_space<vmem>>, vector<128x128xbf16>
    %98 = arith.truncf %96 : vector<64x128xf32> to vector<64x128xbf16>
    %cst_51 = arith.constant dense<0.000000e+00> : vector<64x128xf32>
    %99 = tpu.matmul %98, %97, %cst_51 {dimension_numbers = #tpu.dot_dimension_numbers<[1], [0], [0], [1], [0, 0, 1, 1], [], []>} : vector<64x128xbf16>, vector<128x128xbf16>, vector<64x128xf32> -> vector<64x128xf32>
    %c0_52 = arith.constant 0 : index
    %c0_53 = arith.constant 0 : index
    %100 = vector.load %arg12[%c0_52, %c0_53] : memref<64x128xf32, #tpu.memory_space<vmem>>, vector<64x128xf32>
    %101 = arith.mulf %100, %99 : vector<64x128xf32>
    %cst_54 = arith.constant dense<0.000000e+00> : vector<128xf32>
    %102 = vector.multi_reduction <add>, %101, %cst_54 [0] : vector<64x128xf32> to vector<128xf32>
    %103 = vector.shape_cast %102 : vector<128xf32> to vector<1x128xf32>
    %c0_55 = arith.constant 0 : index
    %c0_56 = arith.constant 0 : index
    %104 = vector.load %arg13[%c0_55, %c0_56] : memref<1x128xf32, #tpu.memory_space<vmem>>, vector<1x128xf32>
    tpu.vector_store %arg13[%c0_55, %c0_56], %103 {strides = array<i32>} : memref<1x128xf32, #tpu.memory_space<vmem>>, vector<1x128xf32>,
    return
  }
  func.func @transform_0(%arg0: i32) -> (i32, i32) {
    %c0_i32 = arith.constant 0 : i32
    %c0_i32_0 = arith.constant 0 : i32
    return %c0_i32, %arg0 : i32, i32
  }
  func.func @transform_1(%arg0: i32) -> (i32, i32) {
    %c0_i32 = arith.constant 0 : i32
    %c0_i32_0 = arith.constant 0 : i32
    %c0_i32_1 = arith.constant 0 : i32
    return %c0_i32, %c0_i32_0 : i32, i32
  }
  func.func @transform_2(%arg0: i32) -> (i32, i32, i32) {
    %c0_i32 = arith.constant 0 : i32
    %c0_i32_0 = arith.constant 0 : i32
    %c0_i32_1 = arith.constant 0 : i32
    %c0_i32_2 = arith.constant 0 : i32
    return %c0_i32, %c0_i32_0, %c0_i32_1 : i32, i32, i32
  }
  func.func @transform_3(%arg0: i32) -> (i32, i32, i32) {
    %c0_i32 = arith.constant 0 : i32
    %c0_i32_0 = arith.constant 0 : i32
    %c0_i32_1 = arith.constant 0 : i32
    %c0_i32_2 = arith.constant 0 : i32
    return %c0_i32, %c0_i32_0, %c0_i32_1 : i32, i32, i32
  }
  func.func @transform_4(%arg0: i32) -> (i32, i32) {
    %c0_i32 = arith.constant 0 : i32
    %c0_i32_0 = arith.constant 0 : i32
    %c0_i32_1 = arith.constant 0 : i32
    return %c0_i32, %c0_i32_0 : i32, i32
  }
  func.func @transform_5(%arg0: i32) -> (i32, i32) {
    %c0_i32 = arith.constant 0 : i32
    %c0_i32_0 = arith.constant 0 : i32
    %c0_i32_1 = arith.constant 0 : i32
    return %c0_i32, %c0_i32_0 : i32, i32
  }
  func.func @transform_6(%arg0: i32) -> (i32, i32) {
    %c0_i32 = arith.constant 0 : i32
    %c0_i32_0 = arith.constant 0 : i32
    %c0_i32_1 = arith.constant 0 : i32
    return %c0_i32, %c0_i32_0 : i32, i32
  }
  func.func @transform_7(%arg0: i32) -> (i32, i32) {
    %c0_i32 = arith.constant 0 : i32
    %c0_i32_0 = arith.constant 0 : i32
    %c0_i32_1 = arith.constant 0 : i32
    return %c0_i32, %c0_i32_0 : i32, i32
  }
  func.func @transform_8(%arg0: i32) -> (i32, i32) {
    %c0_i32 = arith.constant 0 : i32
    %c0_i32_0 = arith.constant 0 : i32
    %c0_i32_1 = arith.constant 0 : i32
    return %c0_i32, %c0_i32_0 : i32, i32
  }
  func.func @transform_9(%arg0: i32) -> (i32, i32) {
    %c0_i32 = arith.constant 0 : i32
    %c0_i32_0 = arith.constant 0 : i32
    %c0_i32_1 = arith.constant 0 : i32
    return %c0_i32, %c0_i32_0 : i32, i32
  }
  func.func @transform_10(%arg0: i32) -> (i32, i32) {
    %c0_i32 = arith.constant 0 : i32
    %c0_i32_0 = arith.constant 0 : i32
    %c0_i32_1 = arith.constant 0 : i32
    return %c0_i32, %c0_i32_0 : i32, i32
  }
  func.func @transform_11(%arg0: i32) -> (i32, i32) {
    %c0_i32 = arith.constant 0 : i32
    %c0_i32_0 = arith.constant 0 : i32
    %c0_i32_1 = arith.constant 0 : i32
    return %c0_i32, %c0_i32_0 : i32, i32
  }
  func.func @transform_12(%arg0: i32) -> (i32, i32) {
    %c0_i32 = arith.constant 0 : i32
    %c0_i32_0 = arith.constant 0 : i32
    return %c0_i32, %arg0 : i32, i32
  }
}

</mosaic_0001>

<bundles_post_ra>
// kernel: tpu_custom_call.1
= control target key start
LH: loop header
LB: loop body
LE: loop exit
PB: predicated region body
PF: predicated region fallthrough
CT: control target
= control target key end

     0   :  { %s4672_s0 = inlined_call_operand.hbm [shape: f32[64,256], index: 0, kind: input, shape index: {}]   ;;  %s4673_s1 = inlined_call_operand.hbm [shape: bf16[128,128], index: 1, kind: input, shape index: {}]   ;;  %s4674_s2 = inlined_call_operand.hbm [shape: f32[2,64,128], index: 2, kind: input, shape index: {}]   ;;  %s4675_s3 = inlined_call_operand.hbm [shape: f32[2,64,128], index: 3, kind: input, shape index: {}]   ;;  %s4676_s4 = inlined_call_operand.hbm [shape: f32[64,128], index: 4, kind: input, shape index: {}]   ;;  %s4677_s5 = inlined_call_operand.hbm [shape: f32[64,128], index: 5, kind: input, shape index: {}]   ;;  %s4678_s6 = inlined_call_operand.hbm [shape: bf16[128,128], index: 6, kind: input, shape index: {}]   ;;  %s4679_s7 = inlined_call_operand.hbm [shape: bf16[256,256], index: 7, kind: input, shape index: {}]   ;;  %s4680_s8 = inlined_call_operand.hbm [shape: bf16[128,128], index: 8, kind: input, shape index: {}]   ;;  %s4681_s9 = inlined_call_operand.hbm [shape: bf16[256,256], index: 9, kind: input, shape index: {}]   ;;  %s4682_s10 = inlined_call_operand.hbm [shape: bf16[128,128], index: 10, kind: input, shape index: {}]   ;;  %s4683_s11 = inlined_call_operand.hbm [shape: f32[64,128], index: 11, kind: input, shape index: {}]   ;;  %s4684_s12 = inlined_call_operand.hbm [shape: f32[1,256], index: 12, kind: output, shape index: {}]  }
   0x1   :  { %4763 = sst [smem:[#allocation83_spill]] %s4672_s0 }
   0x2   :  { %4764 = sst [smem:[#allocation84_spill]] %s4673_s1 }
   0x3   :  { %4765 = sst [smem:[#allocation85_spill]] %s4674_s2 }
   0x4   :  { %4766 = sst [smem:[#allocation86_spill]] %s4675_s3 }
   0x5   :  { %4767 = sst [smem:[#allocation87_spill]] %s4684_s12 }
   0x6   :  { %17 = vsyncpa [#allocation3], 0 }
   0x7   :  { %19 = vsyncpa [#allocation3 + $0x1], 0 }
   0x8   :  { %20 = vsyncpa [#allocation6], 0 }
   0x9   :  { %21 = vsyncpa [#allocation9], 0 }
   0xa   :  { %22 = vsyncpa [#allocation12], 0 }
   0xb   :  { %23 = vsyncpa [#allocation15], 0 }
   0xc   :  { %24 = vsyncpa [#allocation18], 0 }
   0xd   :  { %25 = vsyncpa [#allocation21], 0 }
   0xe   :  { %26 = vsyncpa [#allocation4], 0 }
   0xf   :  { %28 = vsyncpa [#allocation4 + $0x1], 0  ;;  %s3791_s21 = smov 0   ;;  %s3793_s22 = smov 0  }
  0x10   :  { %s3795_s23 = smov 0   ;;  %s3797_s24 = smov 0  }
  0x11 LB: > { %s3706_s25 = smov [#allocation5]   ;;  %s3812_s27 = sadd.s32 4294967295, %s3704_s24   ;;  %s3704_s24 = sphi %s3797_s24, %s4909_s24   ;;  %s3700_s23 = sphi %s3795_s23, %s4908_s23   ;;  %s3696_s22 = sphi %s3793_s22, %s4907_s22   ;;  %s3692_s21 = sphi %s3791_s21, %s4906_s21  }
  0x12   : > { %s334_s26 = sshll.u32 %s3706_s25, 4  ;;  %4768 = sst [smem:[#allocation31_spill]] %s3812_s27  ;;  %s3817_s26 = int_to_ptr.vmem [resolvable:$true] %s334_s26 }
  0x13   : > { %p2585_p0 = scmp.ge.s32.totalorder %s3704_s24, 1  ;;  %p4693_p1 = scmp.eq.s32.totalorder %s3812_s27, 0 }
  0x14   : > { %p322_p2 = scmp.lt.s32.totalorder %s3704_s24, 3  ;;  %s3707_s30 = smov [#allocation8]  }
  0x15   : > { %s360_s13 = sshll.u32 %s3707_s30, 4  ;;  %s3708_s14 = smov [#allocation11]   ;;  %s3832_s13 = int_to_ptr.vmem [resolvable:$true] %s360_s13 }
  0x16   : > { %p3819_p3 = pnand %p2585_p0, %p322_p2  ;;  %s3834_s15 = sshll.u32 %s3708_s14, 4  ;;  %s387_s15 = int_to_ptr.vmem [resolvable:$true] %s3834_s15 }
  0x17   : > { %s4772_s1 = sld [smem:[#allocation84_spill]] }
  0x18   : > { %s4769_s28 = scalar_select %p3819_p3, 1, 0 }
  0x19   : > { %p3017_p5 = pneg %p3819_p3 }
  0x1a   : > { %4770 = sst [smem:[#allocation32_spill]] %s4769_s28 }
  0x1b   : > { %p3828_p6 = pnand %p3017_p5, %p4693_p1 }
  0x1d   : > { %s3276_s18 = scalar_lea.hbm %s4772_s1, 1024  ;;  %p3844_p8 = pneg %p3828_p6 }
  0x1e   : > { %p3277_p7 = scmp.ne.s32.totalorder %s4772_s1, %s3276_s18  ;;  %p3283_p11 = scmp.lt.u32.totalorder %s3276_s18, %s4772_s1 }
  0x20   : > { %p3279_p9 = pnand %p3844_p8, %p3277_p7 }
  0x22   : > { %p3280_p10 = pneg %p3279_p9 }
  0x24   : > { %p3285_p12 = pnand %p3283_p11, %p3280_p10 }
  0x26   : > { %3288 = shalt.err (!%p3285_p12)
}
  0x27   : > { %s3289_s16 = scalar_lea.vmem %s3817_s26, 1024  ;;  %p3297_p5 = scmp.lt.s32.totalorder %s3817_s26, %s3817_s26 }
  0x28   : > { %p3290_p13 = scmp.ne.s32.totalorder %s3817_s26, %s3289_s16  ;;  %p3298_p4 = scmp.lt.s32.totalorder %s3289_s16, %s3289_s16 }
  0x2a   : > { %p3292_p0 = pnand %p3290_p13, %p3844_p8  ;;  %p3299_p7 = por %p3298_p4, %p3297_p5 }
  0x2c   : > { %p3293_p2 = pneg %p3292_p0 }
  0x2e   : > { %p3300_p9 = pnand %p3299_p7, %p3293_p2 }
  0x30   : > { %3303 = shalt.err (!%p3300_p9)
}
  0x31   : > { %s4691_s17 = smov 64   ;;  %s4695_s18 = smov 4  }
  0x32   : > { %3020 = dma.hbm_to_vmem [thread:$0]  (!%p3828_p6), %s4772_s1, 1024, %s3817_s26, [#allocation6], %s4691_s17, %s4691_s17, %s4695_s18  }
  0x33   : > { %s4774_s3 = sld [smem:[#allocation86_spill]] }
  0x39   : > { %s3304_s16 = scalar_lea.hbm %s4774_s3, 2048 }
  0x3a   : > { %p3305_p4 = scmp.ne.s32.totalorder %s4774_s3, %s3304_s16  ;;  %p3311_p12 = scmp.lt.u32.totalorder %s3304_s16, %s4774_s3 }
  0x3c   : > { %p3307_p10 = pnand %p3305_p4, %p3844_p8 }
  0x3e   : > { %p3308_p11 = pneg %p3307_p10 }
  0x40   : > { %p3313_p13 = pnand %p3311_p12, %p3308_p11 }
  0x42   : > { %3316 = shalt.err (!%p3313_p13)
}
  0x43   : > { %s3317_s26 = scalar_lea.vmem %s3832_s13, 2048  ;;  %p3325_p7 = scmp.lt.s32.totalorder %s3832_s13, %s3832_s13 }
  0x44   : > { %p3318_p0 = scmp.ne.s32.totalorder %s3832_s13, %s3317_s26  ;;  %p3326_p9 = scmp.lt.s32.totalorder %s3317_s26, %s3317_s26 }
  0x46   : > { %p3320_p2 = pnand %p3318_p0, %p3844_p8  ;;  %p3327_p4 = por %p3326_p9, %p3325_p7 }
  0x48   : > { %p3321_p5 = pneg %p3320_p2 }
  0x4a   : > { %p3328_p10 = pnand %p3327_p4, %p3321_p5 }
  0x4c   : > { %3331 = shalt.err (!%p3328_p10)
}
  0x4d   : > { %s4697_s12 = smov 128   ;;  %s4699_s0 = smov 8  }
  0x4e   : > { %3026 = dma.hbm_to_vmem [thread:$0]  (!%p3828_p6), %s4774_s3, 2048, %s3832_s13, [#allocation9], %s4697_s12, %s4697_s12, %s4699_s0  }
  0x4f   : > { %s3332_s30 = scalar_lea.hbm %s4677_s5, 1024 }
  0x50   : > { %p3333_p11 = scmp.ne.s32.totalorder %s4677_s5, %s3332_s30  ;;  %p3339_p0 = scmp.lt.u32.totalorder %s3332_s30, %s4677_s5 }
  0x52   : > { %p3335_p12 = pnand %p3333_p11, %p3844_p8 }
  0x54   : > { %p3336_p13 = pneg %p3335_p12 }
  0x56   : > { %p3341_p2 = pnand %p3339_p0, %p3336_p13 }
  0x58   : > { %3344 = shalt.err (!%p3341_p2)
}
  0x59   : > { %s3345_s27 = scalar_lea.vmem %s387_s15, 1024  ;;  %p3353_p4 = scmp.lt.s32.totalorder %s387_s15, %s387_s15 }
  0x5a   : > { %p3346_p5 = scmp.ne.s32.totalorder %s387_s15, %s3345_s27  ;;  %p3354_p10 = scmp.lt.s32.totalorder %s3345_s27, %s3345_s27 }
  0x5c   : > { %p3348_p7 = pnand %p3346_p5, %p3844_p8  ;;  %p3355_p1 = por %p3354_p10, %p3353_p4 }
  0x5e   : > { %p3349_p9 = pneg %p3348_p7 }
  0x60   : > { %p3356_p3 = pnand %p3355_p1, %p3349_p9 }
  0x62   : > { %3359 = shalt.err (!%p3356_p3)
}
  0x63   : > { %3032 = dma.hbm_to_vmem [thread:$0]  (!%p3828_p6), %s4677_s5, 1024, %s387_s15, [#allocation12], %s4697_s12, %s4697_s12, %s4699_s0  }
  0x64   : > { %s3713_s28 = smov [#allocation14]   ;;  %s3714_s20 = smov [#allocation17]  }
  0x65   : > { %s412_s19 = sshll.u32 %s3713_s28, 4  ;;  %s438_s30 = sshll.u32 %s3714_s20, 4  ;;  %s413_s19 = int_to_ptr.vmem [resolvable:$true] %s412_s19  ;;  %s439_s30 = int_to_ptr.vmem [resolvable:$true] %s438_s30 }
  0x66   : > { %s3360_s26 = scalar_lea.hbm %s4679_s7, 4096 }
  0x67   : > { %p3361_p1 = scmp.ne.s32.totalorder %s4679_s7, %s3360_s26  ;;  %p3367_p12 = scmp.lt.u32.totalorder %s3360_s26, %s4679_s7 }
  0x69   : > { %p3363_p3 = pnand %p3361_p1, %p3844_p8 }
  0x6b   : > { %p3364_p11 = pneg %p3363_p3 }
  0x6d   : > { %p3369_p13 = pnand %p3367_p12, %p3364_p11 }
  0x6f   : > { %3372 = shalt.err (!%p3369_p13)
}
  0x70   : > { %s3373_s15 = scalar_lea.vmem %s413_s19, 4096  ;;  %p3381_p7 = scmp.lt.s32.totalorder %s413_s19, %s413_s19 }
  0x71   : > { %p3374_p0 = scmp.ne.s32.totalorder %s413_s19, %s3373_s15  ;;  %p3382_p9 = scmp.lt.s32.totalorder %s3373_s15, %s3373_s15 }
  0x73   : > { %p3376_p2 = pnand %p3374_p0, %p3844_p8  ;;  %p3383_p4 = por %p3382_p9, %p3381_p7 }
  0x75   : > { %p3377_p5 = pneg %p3376_p2 }
  0x77   : > { %p3384_p10 = pnand %p3383_p4, %p3377_p5 }
  0x79   : > { %3387 = shalt.err (!%p3384_p10)
}
  0x7a   : > { %3038 = dma.hbm_to_vmem [thread:$0]  (!%p3828_p6), %s4679_s7, 4096, %s413_s19, [#allocation15], %s4697_s12, %s4697_s12, %s4699_s0  }
  0x7b   : > { %s3388_s20 = scalar_lea.hbm %s4681_s9, 4096 }
  0x7c   : > { %p3389_p1 = scmp.ne.s32.totalorder %s4681_s9, %s3388_s20  ;;  %p3395_p12 = scmp.lt.u32.totalorder %s3388_s20, %s4681_s9 }
  0x7e   : > { %p3391_p3 = pnand %p3389_p1, %p3844_p8 }
  0x80   : > { %p3392_p11 = pneg %p3391_p3 }
  0x82   : > { %p3397_p13 = pnand %p3395_p12, %p3392_p11 }
  0x84   : > { %3400 = shalt.err (!%p3397_p13)
}
  0x85   : > { %s3401_s13 = scalar_lea.vmem %s439_s30, 4096  ;;  %p3409_p7 = scmp.lt.s32.totalorder %s439_s30, %s439_s30 }
  0x86   : > { %p3402_p0 = scmp.ne.s32.totalorder %s439_s30, %s3401_s13  ;;  %p3410_p9 = scmp.lt.s32.totalorder %s3401_s13, %s3401_s13 }
  0x88   : > { %p3404_p2 = pnand %p3402_p0, %p3844_p8  ;;  %p3411_p4 = por %p3410_p9, %p3409_p7 }
  0x8a   : > { %p3405_p5 = pneg %p3404_p2 }
  0x8c   : > { %p3412_p10 = pnand %p3411_p4, %p3405_p5 }
  0x8e   : > { %3415 = shalt.err (!%p3412_p10)
}
  0x8f   : > { %3044 = dma.hbm_to_vmem [thread:$0]  (!%p3828_p6), %s4681_s9, 4096, %s439_s30, [#allocation18], %s4697_s12, %s4697_s12, %s4699_s0  }
  0x90   : > { %s3715_s1 = smov [#allocation7]   ;;  %s3716_s17 = smov [#allocation10]  }
  0x91   : > { %s347_s18 = sshll.u32 %s3715_s1, 4  ;;  %s373_s28 = sshll.u32 %s3716_s17, 4  ;;  %s348_s18 = int_to_ptr.vmem [resolvable:$true] %s347_s18  ;;  %s374_s28 = int_to_ptr.vmem [resolvable:$true] %s373_s28 }
  0x92   : > { %s4775_s2 = sld [smem:[#allocation85_spill]] }
  0x98   : > { %s3416_s16 = scalar_lea.hbm %s4775_s2, 2048 }
  0x99   : > { %p3417_p1 = scmp.ne.s32.totalorder %s4775_s2, %s3416_s16  ;;  %p3423_p12 = scmp.lt.u32.totalorder %s3416_s16, %s4775_s2 }
  0x9b   : > { %p3419_p3 = pnand %p3417_p1, %p3844_p8 }
  0x9d   : > { %p3420_p11 = pneg %p3419_p3 }
  0x9f   : > { %p3425_p13 = pnand %p3423_p12, %p3420_p11 }
  0xa1   : > { %3428 = shalt.err (!%p3425_p13)
}
  0xa2   : > { %s3429_s30 = scalar_lea.vmem %s348_s18, 2048  ;;  %p3437_p7 = scmp.lt.s32.totalorder %s348_s18, %s348_s18 }
  0xa3   : > { %p3430_p0 = scmp.ne.s32.totalorder %s348_s18, %s3429_s30  ;;  %p3438_p9 = scmp.lt.s32.totalorder %s3429_s30, %s3429_s30 }
  0xa5   : > { %p3432_p2 = pnand %p3430_p0, %p3844_p8  ;;  %p3439_p4 = por %p3438_p9, %p3437_p7 }
  0xa7   : > { %p3433_p5 = pneg %p3432_p2 }
  0xa9   : > { %p3440_p10 = pnand %p3439_p4, %p3433_p5 }
  0xab   : > { %3443 = shalt.err (!%p3440_p10)
}
  0xac   : > { %3023 = dma.hbm_to_vmem [thread:$0]  (!%p3828_p6), %s4775_s2, 2048, %s348_s18, [#allocation6], %s4697_s12, %s4697_s12, %s4699_s0  }
  0xad   : > { %s3444_s14 = scalar_lea.hbm %s4676_s4, 1024 }
  0xae   : > { %p3445_p1 = scmp.ne.s32.totalorder %s4676_s4, %s3444_s14  ;;  %p3451_p12 = scmp.lt.u32.totalorder %s3444_s14, %s4676_s4 }
  0xb0   : > { %p3447_p3 = pnand %p3445_p1, %p3844_p8 }
  0xb2   : > { %p3448_p11 = pneg %p3447_p3 }
  0xb4   : > { %p3453_p13 = pnand %p3451_p12, %p3448_p11 }
  0xb6   : > { %3456 = shalt.err (!%p3453_p13)
}
  0xb7   : > { %s3457_s19 = scalar_lea.vmem %s374_s28, 1024  ;;  %p3465_p7 = scmp.lt.s32.totalorder %s374_s28, %s374_s28 }
  0xb8   : > { %p3458_p0 = scmp.ne.s32.totalorder %s374_s28, %s3457_s19  ;;  %p3466_p9 = scmp.lt.s32.totalorder %s3457_s19, %s3457_s19 }
  0xba   : > { %p3460_p2 = pnand %p3458_p0, %p3844_p8  ;;  %p3467_p4 = por %p3466_p9, %p3465_p7 }
  0xbc   : > { %p3461_p5 = pneg %p3460_p2 }
  0xbe   : > { %p3468_p10 = pnand %p3467_p4, %p3461_p5 }
  0xc0   : > { %3471 = shalt.err (!%p3468_p10)
}
  0xc1   : > { %3029 = dma.hbm_to_vmem [thread:$0]  (!%p3828_p6), %s4676_s4, 1024, %s374_s28, [#allocation9], %s4697_s12, %s4697_s12, %s4699_s0  }
  0xc2   : > { %s3717_s15 = smov [#allocation13]   ;;  %s3718_s17 = smov [#allocation16]  }
  0xc3   : > { %s399_s1 = sshll.u32 %s3717_s15, 4  ;;  %s425_s20 = sshll.u32 %s3718_s17, 4  ;;  %s400_s1 = int_to_ptr.vmem [resolvable:$true] %s399_s1  ;;  %s426_s20 = int_to_ptr.vmem [resolvable:$true] %s425_s20 }
  0xc4   : > { %s3472_s26 = scalar_lea.hbm %s4678_s6, 1024 }
  0xc5   : > { %p3473_p1 = scmp.ne.s32.totalorder %s4678_s6, %s3472_s26  ;;  %p3479_p12 = scmp.lt.u32.totalorder %s3472_s26, %s4678_s6 }
  0xc7   : > { %p3475_p3 = pnand %p3473_p1, %p3844_p8 }
  0xc9   : > { %p3476_p11 = pneg %p3475_p3 }
  0xcb   : > { %p3481_p13 = pnand %p3479_p12, %p3476_p11 }
  0xcd   : > { %3484 = shalt.err (!%p3481_p13)
}
  0xce   : > { %s3485_s28 = scalar_lea.vmem %s400_s1, 1024  ;;  %p3493_p7 = scmp.lt.s32.totalorder %s400_s1, %s400_s1 }
  0xcf   : > { %p3486_p0 = scmp.ne.s32.totalorder %s400_s1, %s3485_s28  ;;  %p3494_p9 = scmp.lt.s32.totalorder %s3485_s28, %s3485_s28 }
  0xd1   : > { %p3488_p2 = pnand %p3486_p0, %p3844_p8  ;;  %p3495_p4 = por %p3494_p9, %p3493_p7 }
  0xd3   : > { %p3489_p5 = pneg %p3488_p2 }
  0xd5   : > { %p3496_p10 = pnand %p3495_p4, %p3489_p5 }
  0xd7   : > { %3499 = shalt.err (!%p3496_p10)
}
  0xd8   : > { %s4776_s30 = smov 4   ;;  %s4777_s15 = smov 64  }
  0xd9   : > { %3035 = dma.hbm_to_vmem [thread:$0]  (!%p3828_p6), %s4678_s6, 1024, %s400_s1, [#allocation12], %s4777_s15, %s4777_s15, %s4776_s30  }
  0xda   : > { %s3500_s27 = scalar_lea.hbm %s4680_s8, 1024 }
  0xdb   : > { %p3501_p1 = scmp.ne.s32.totalorder %s4680_s8, %s3500_s27  ;;  %p3507_p12 = scmp.lt.u32.totalorder %s3500_s27, %s4680_s8 }
  0xdd   : > { %p3503_p3 = pnand %p3501_p1, %p3844_p8 }
  0xdf   : > { %p3504_p11 = pneg %p3503_p3 }
  0xe1   : > { %p3509_p13 = pnand %p3507_p12, %p3504_p11 }
  0xe3   : > { %3512 = shalt.err (!%p3509_p13)
}
  0xe4   : > { %s3513_s17 = scalar_lea.vmem %s426_s20, 1024  ;;  %p3521_p7 = scmp.lt.s32.totalorder %s426_s20, %s426_s20 }
  0xe5   : > { %p3514_p0 = scmp.ne.s32.totalorder %s426_s20, %s3513_s17  ;;  %p3522_p9 = scmp.lt.s32.totalorder %s3513_s17, %s3513_s17 }
  0xe7   : > { %p3516_p2 = pnand %p3514_p0, %p3844_p8  ;;  %p3523_p4 = por %p3522_p9, %p3521_p7 }
  0xe9   : > { %p3517_p5 = pneg %p3516_p2 }
  0xeb   : > { %p3524_p10 = pnand %p3523_p4, %p3517_p5 }
  0xed   : > { %3527 = shalt.err (!%p3524_p10)
}
  0xee   : > { %3041 = dma.hbm_to_vmem [thread:$0]  (!%p3828_p6), %s4680_s8, 1024, %s426_s20, [#allocation15], %s4777_s15, %s4777_s15, %s4776_s30  }
  0xef   : > { %s3719_s16 = smov [#allocation19]   ;;  %s3720_s27 = smov [#allocation20]  }
  0xf0   : > { %s451_s26 = sshll.u32 %s3719_s16, 4  ;;  %s464_s13 = sshll.u32 %s3720_s27, 4  ;;  %s452_s26 = int_to_ptr.vmem [resolvable:$true] %s451_s26  ;;  %s465_s13 = int_to_ptr.vmem [resolvable:$true] %s464_s13 }
  0xf1   : > { %s3528_s28 = scalar_lea.hbm %s4682_s10, 1024 }
  0xf2   : > { %p3529_p1 = scmp.ne.s32.totalorder %s4682_s10, %s3528_s28  ;;  %p3535_p12 = scmp.lt.u32.totalorder %s3528_s28, %s4682_s10 }
  0xf4   : > { %p3531_p3 = pnand %p3529_p1, %p3844_p8 }
  0xf6   : > { %p3532_p11 = pneg %p3531_p3 }
  0xf8   : > { %p3537_p13 = pnand %p3535_p12, %p3532_p11 }
  0xfa   : > { %3540 = shalt.err (!%p3537_p13)
}
  0xfb   : > { %s3541_s20 = scalar_lea.vmem %s452_s26, 1024  ;;  %p3549_p7 = scmp.lt.s32.totalorder %s452_s26, %s452_s26 }
  0xfc   : > { %p3542_p0 = scmp.ne.s32.totalorder %s452_s26, %s3541_s20  ;;  %p3550_p9 = scmp.lt.s32.totalorder %s3541_s20, %s3541_s20 }
  0xfe   : > { %p3544_p2 = pnand %p3542_p0, %p3844_p8  ;;  %p3551_p4 = por %p3550_p9, %p3549_p7 }
 0x100   : > { %p3545_p5 = pneg %p3544_p2 }
 0x102   : > { %p3552_p10 = pnand %p3551_p4, %p3545_p5 }
 0x104   : > { %3555 = shalt.err (!%p3552_p10)
}
 0x105   : > { %3047 = dma.hbm_to_vmem [thread:$0]  (!%p3828_p6), %s4682_s10, 1024, %s452_s26, [#allocation18], %s4777_s15, %s4777_s15, %s4776_s30  }
 0x106   : > { %s3556_s27 = scalar_lea.hbm %s4683_s11, 1024 }
 0x107   : > { %p3557_p1 = scmp.ne.s32.totalorder %s4683_s11, %s3556_s27  ;;  %p3563_p12 = scmp.lt.u32.totalorder %s3556_s27, %s4683_s11 }
 0x109   : > { %p3559_p3 = pnand %p3557_p1, %p3844_p8 }
 0x10b   : > { %p3560_p11 = pneg %p3559_p3 }
 0x10d   : > { %p3565_p13 = pnand %p3563_p12, %p3560_p11 }
 0x10f   : > { %3568 = shalt.err (!%p3565_p13)
}
 0x110   : > { %s3569_s1 = scalar_lea.vmem %s465_s13, 1024  ;;  %p3577_p7 = scmp.lt.s32.totalorder %s465_s13, %s465_s13 }
 0x111   : > { %p3570_p0 = scmp.ne.s32.totalorder %s465_s13, %s3569_s1  ;;  %p3578_p9 = scmp.lt.s32.totalorder %s3569_s1, %s3569_s1 }
 0x113   : > { %p3572_p2 = pnand %p3570_p0, %p3844_p8  ;;  %p3579_p4 = por %p3578_p9, %p3577_p7 }
 0x115   : > { %p3573_p5 = pneg %p3572_p2 }
 0x117   : > { %p3580_p10 = pnand %p3579_p4, %p3573_p5 }
 0x119   : > { %3583 = shalt.err (!%p3580_p10)
}
 0x11a   : > { %s4778_s30 = smov 8   ;;  %s4779_s15 = smov 128  }
 0x11b   : > { %s4780_s25 = sld [smem:[#allocation31_spill]]  ;;  %s2584_s29 = sadd.s32 4294967294, %s3704_s24  }
 0x11c   : > { %3050 = dma.hbm_to_vmem [thread:$0]  (!%p3828_p6), %s4683_s11, 1024, %s465_s13, [#allocation21], %s4779_s15, %s4779_s15, %s4778_s30  }
 0x11d   : > { %s4086_s12 = sadd.s32 1, %s3704_s24   ;;  %s41_s0 = sadd.s32 1, %s3700_s23 }
 0x11e   : > { %s38_s14 = ssub.s32 %s3704_s24, %s4086_s12  ;;  %p48_p8 = scmp.ne.s32.totalorder %s3700_s23, %s3696_s22 }
 0x11f   : > { %p39_p1 = scmp.eq.s32.totalorder %s38_s14, 0  ;;  %p49_p3 = scmp.eq.s32.totalorder %s3704_s24, 0 }
 0x120   : > { %p54_p11 = scmp.ne.s32.totalorder %s3696_s22, %s3692_s21  ;;  %p315_p5 = scmp.eq.s32.totalorder %s2584_s29, 1 }
 0x121   : > { %p309_p12 = scmp.eq.s32.totalorder %s4780_s25, 1  ;;  %p50_p13 = por %p49_p3, %p48_p8 }
 0x122   : > { %s4098_s16 = scalar_select %p39_p1, %s3700_s23, %s41_s0  }
 0x123   : > { %p4781_p0 = scmp.eq.s32.totalorder %s4780_s25, 0  ;;  %p4106_p6 = por %p309_p12, %p48_p8 }
 0x124   : > { %p3070_p7 = scmp.lt.s32.totalorder %s3704_s24, 2  ;;  %s478_s19 = sand.u32 1, %s3700_s23  }
 0x125   : > { %p4102_p2 = por %p4781_p0, %p54_p11  ;;  %p4112_p9 = por %p315_p5, %p54_p11 }
 0x126   : > { %s4783_s13 = scalar_select %p4106_p6, 1, 0 }
 0x127   : > { %s4784_s18 = scalar_select %p4112_p9, 1, 0 }
 0x128   : > { %s2598_s28 = sshll.u32 %s478_s19, 6  ;;  %s2599_s17 = sshll.u32 %s3704_s24, 7 }
 0x129   : > { %s4785_s20 = sld [smem:[#allocation83_spill]]  ;;  %s482_s0 = scalar_lea.vmem [#allocation2], %s2598_s28 }
 0x12a   : > { %s488_s14 = sshll.u32 %s482_s0, 4  ;;  %p4122_p4 = pnand %p3070_p7, %p50_p13  ;;  %s4126_s14 = int_to_ptr.vmem [resolvable:$true] %s488_s14 }
 0x12b   : > { %s4128_s2 = scalar_lea.sflag [#allocation3], %s478_s19 }
 0x12c   : > { %p3586_p8 = pneg %p4122_p4 }
 0x12f   : > { %s4120_s25 = scalar_lea.hbm %s4785_s20, %s2599_s17  ;;  %s3589_s1 = scalar_lea.hbm %s4785_s20, 2048 }
 0x130   : > { %s3584_s3 = scalar_lea.hbm %s4120_s25, 1024  ;;  %p3590_p11 = scmp.lt.u32.totalorder %s4120_s25, %s4785_s20 }
 0x131   : > { %p3585_p10 = scmp.ne.s32.totalorder %s4120_s25, %s3584_s3  ;;  %p3591_p12 = scmp.lt.u32.totalorder %s3589_s1, %s3584_s3 }
 0x132   : > { %p3593_p0 = scmp.lt.u32.totalorder %s3584_s3, %s4120_s25 }
 0x133   : > { %p3587_p1 = pnand %p3586_p8, %p3585_p10  ;;  %p3592_p13 = por %p3591_p12, %p3590_p11 }
 0x135   : > { %p3588_p3 = pneg %p3587_p1  ;;  %p3594_p5 = por %p3593_p0, %p3592_p13 }
 0x137   : > { %p3595_p7 = pnand %p3594_p5, %p3588_p3 }
 0x139   : > { %3598 = shalt.err (!%p3595_p7)
}
 0x13a   : > { %s3599_s19 = scalar_lea.vmem %s4126_s14, 1024  ;;  %s3721_s28 = smov [#allocation2]  }
 0x13b   : > { %p3600_p10 = scmp.ne.s32.totalorder %s4126_s14, %s3599_s19  ;;  %s3604_s17 = sshll.u32 %s3721_s28, 4  ;;  %s3605_s17 = int_to_ptr.vmem [resolvable:$false] %s3604_s17 }
 0x13c   : > { %s3606_s26 = scalar_lea.vmem %s3605_s17, 2048  ;;  %p3607_p6 = scmp.lt.s32.totalorder %s4126_s14, %s3605_s17 }
 0x13d   : > { %p3602_p1 = pnand %p3600_p10, %p3586_p8  ;;  %p3608_p11 = scmp.lt.s32.totalorder %s3606_s26, %s3599_s19 }
 0x13f   : > { %p3603_p9 = pneg %p3602_p1  ;;  %p3609_p12 = por %p3608_p11, %p3607_p6 }
 0x141   : > { %p3610_p13 = pnand %p3609_p12, %p3603_p9 }
 0x143   : > { %3613 = shalt.err (!%p3610_p13)
}
 0x144   : > { %s3722_s3 = smov 256   ;;  %s4787_s1 = sld [smem:[#allocation32_spill]] }
 0x145   : > { %3054 = dma.hbm_to_vmem [thread:$0]  (!%p4122_p4), %s4120_s25, 1024, %s4126_s14, %s4128_s2, %s3722_s3, %s4779_s15, %s4778_s30  }
 0x14a   : > { %p4788_p8 = scmp.ne.s32.totalorder %s4787_s1, 0 }
 0x14c   : > { %500 = sbr.rel (%p4788_p8) target bundleno = 2906 (0xb5a), region = 68 }
 0x153   : > { %s4161_s0 = sand.u32 1, %s3696_s22  }
 0x154   : > { %s2601_s19 = sshll.u32 %s4161_s0, 6  ;;  %s503_s28 = scalar_lea.sflag [#allocation3], %s4161_s0 }
 0x155   : > { %s4165_s17 = scalar_lea.vmem [#allocation2], %s2601_s19 }
 0x156   : > { %3659 = dma.done.wait (%p4102_p2), %s503_s28, 1024  }
 0x157   : > { %3661 = vsyncadd (%p4102_p2), %s503_s28, 4294966272  ;;  %s4789_s29 = sld [smem:[#allocation31_spill]] }
 0x15d   : > { %p4790_p6 = scmp.eq.s32.totalorder %s4789_s29, 0 }
 0x15f   : > { %3663 = dma.done.wait (%p4790_p6), [#allocation6], 3072   ;;  %p4791_p9 = pmov %p4790_p6 }
 0x160   : > { %p4792_p4 = pmov %p4790_p6 }
 0x161   : > { %3665 = vsyncadd (%p4791_p9), [#allocation6], 4294964224 }
 0x162   : > { %3667 = dma.done.wait (%p4792_p4), [#allocation9], 3072   ;;  %p4793_p3 = pmov %p4792_p4 }
 0x164   : > { %3669 = vsyncadd (%p4793_p3), [#allocation9], 4294964224  ;;  %p4794_p0 = pmov %p4793_p3 }
 0x166   : > { %3671 = dma.done.wait (%p4794_p0), [#allocation12], 2048   ;;  %p4795_p5 = pmov %p4794_p0 }
 0x167   : > { %p4796_p2 = pmov %p4794_p0 }
 0x168   : > { %3673 = vsyncadd (%p4795_p5), [#allocation12], 4294965248 }
 0x169   : > { %3675 = dma.done.wait (%p4796_p2), [#allocation15], 5120   ;;  %p4797_p7 = pmov %p4794_p0 }
 0x16a   : > { %p4798_p10 = pmov %p4794_p0 }
 0x16b   : > { %3677 = vsyncadd (%p4797_p7), [#allocation15], 4294962176 }
 0x16c   : > { %3679 = dma.done.wait (%p4798_p10), [#allocation18], 5120   ;;  %p4799_p1 = pmov %p4794_p0 }
 0x16d   : > { %p4800_p11 = pmov %p4794_p0 }
 0x16e   : > { %3681 = vsyncadd (%p4799_p1), [#allocation18], 4294962176 }
 0x16f   : > { %3683 = dma.done.wait (%p4800_p11), [#allocation21], 1024   ;;  %p4801_p12 = pmov %p4794_p0 }
 0x170   : > { %v3723_v0 = vmov 0.0   ;;  %vm3724_vm0 = vmmov 0   ;;  %v3133_v1 = vld [vmem:[#allocation5] sm:$0xff]   ;;  %v3134_v2 = vld [vmem:[#allocation5 + $0x8] sm:$0xff]   ;;  %v3135_v3 = vld [vmem:[#allocation5 + $0x10] sm:$0xff]   ;;  %s2709_s2 = sshll.u32 %s4789_s29, 4 }
 0x171   : > { %3685 = vsyncadd (%p4801_p12), [#allocation21], 4294966272  ;;  %2797 = vmatprep.subr.bf16.mxu0 %v3723_v0  ;;  %2813 = vmatprep.mubr.msk.bf16.mxu0 %vm3724_vm0, %v3723_v0  ;;  %v4196_v4 = vld [vmem:[%s4165_s17] sm:$0xff]  ;;  %v4199_v5 = vld [vmem:[%s4165_s17 + $0x8] sm:$0xff]  ;;  %s589_s30 = scalar_lea.vmem [#allocation22], %s4161_s0  ;;  %s4902_s14 = sld [smem:[#allocation87_spill]] }
 0x172   : > { %2798 = vmatpush3.bf16.msra.mxu0 %v3133_v1  ;;  %v4202_v6 = vld [vmem:[%s4165_s17 + $0x10] sm:$0xff]  ;;  %v3136_v7 = vld [vmem:[#allocation5 + $0x18] sm:$0xff]   ;;  %v599_v9 = vmul.f32 %v4196_v4, %v4196_v4  ;;  %v600_v10 = vmul.f32 %v4199_v5, %v4199_v5  ;;  %v4214_v12 = vld [vmem:[%s4165_s17 + $0x20] sm:$0xff]  ;;  %s2413_s15 = sshll.u32 %s589_s30, 4  ;;  %s2401_s3 = scalar_lea.sflag [#allocation4], %s4161_s0  ;;  %s4630_s15 = int_to_ptr.vmem [resolvable:$true] %s2413_s15 }
 0x173   : > { %2799 = vmatprep.subr.bf16.mxu0 %v3723_v0  ;;  %v4205_v8 = vld [vmem:[%s4165_s17 + $0x18] sm:$0xff]  ;;  %v601_v11 = vmul.f32 %v4202_v6, %v4202_v6  ;;  %v4217_v13 = vld [vmem:[%s4165_s17 + $0x28] sm:$0xff]  ;;  %v3137_v16 = vld [vmem:[#allocation5 + $0x20] sm:$0xff]   ;;  %v603_v18 = vmul.f32 %v4214_v12, %v4214_v12  ;;  %s3614_s1 = scalar_lea.vmem %s4630_s15, 16  ;;  %p4903_p8 = scmp.ne.s32.totalorder %s4783_s13, 0 }
 0x174   : > { %v602_v14 = vmul.f32 %v4205_v8, %v4205_v8  ;;  %v607_v15 = vadd.f32 %v600_v10, %v599_v9  ;;  %v4222_v17 = vld [vmem:[%s4165_s17 + $0x30] sm:$0xff]  ;;  %v4227_v20 = vld [vmem:[%s4165_s17 + $0x38] sm:$0xff]  ;;  %v604_v21 = vmul.f32 %v4217_v13, %v4217_v13  ;;  %v3138_v23 = vld [vmem:[#allocation5 + $0x28] sm:$0xff]   ;;  %p3615_p13 = scmp.ne.s32.totalorder %s4630_s15, %s3614_s1  ;;  %s3725_s19 = smov [#allocation22]  }
 0x175   : > { %v605_v24 = vmul.f32 %v4222_v17, %v4222_v17  ;;  %v606_v26 = vmul.f32 %v4227_v20, %v4227_v20  ;;  %v3139_v28 = vld [vmem:[#allocation5 + $0x30] sm:$0xff]   ;;  %v3140_v31 = vld [vmem:[#allocation5 + $0x38] sm:$0xff]   ;;  %v4235_v39 = vld [vmem:[#allocation13] sm:$0xff]   ;;  %s3618_s28 = sshll.u32 %s3725_s19, 4  ;;  %s3619_s28 = int_to_ptr.vmem [resolvable:$false] %s3618_s28 }
 0x176   : > { %2800 = vmatpush3.bf16.msra.mxu0 %v3134_v2  ;;  %v608_v19 = vadd.f32 %v607_v15, %v601_v11  ;;  %2833 = vmatprep.mubr.bf16.mxu1 %v4235_v39  ;;  %v3149_v40 = vld [vmem:[#allocation14] ss:$8 sps:$4 sm:$0xff]   ;;  %v3151_v41 = vld [vmem:[#allocation14 + $0x4] ss:$8 sps:$4 sm:$0xff]   ;;  %v3154_v42 = vld [vmem:[#allocation14 + $0x14] ss:$8 sps:$4 sm:$0xff]   ;;  %p3616_p6 = pnand %p3615_p13, %p4903_p8  ;;  %p3621_p4 = scmp.lt.s32.totalorder %s4630_s15, %s3619_s28 }
 0x177   : > { %2801 = vmatprep.subr.bf16.mxu0 %v3723_v0  ;;  %v3152_v43 = vld [vmem:[#allocation14 + $0x10] ss:$8 sps:$4 sm:$0xff]   ;;  %v3157_v44 = vld [vmem:[#allocation14 + $0x24] ss:$8 sps:$4 sm:$0xff]   ;;  %v3155_v45 = vld [vmem:[#allocation14 + $0x20] ss:$8 sps:$4 sm:$0xff]   ;;  %s4628_s26 = scalar_lea.hbm %s4902_s14, %s2709_s2 }
 0x178   : > { %v609_v22 = vadd.f32 %v608_v19, %v602_v14  ;;  %v3160_v46 = vld [vmem:[#allocation14 + $0x34] ss:$8 sps:$4 sm:$0xff]   ;;  %v3158_v47 = vld [vmem:[#allocation14 + $0x30] ss:$8 sps:$4 sm:$0xff]   ;;  %v3163_v48 = vld [vmem:[#allocation14 + $0x44] ss:$8 sps:$4 sm:$0xff]   ;;  %v735_v14 = vlaneseq  ;;  %p3617_p9 = pneg %p3616_p6 }
 0x179   : > { %v3161_v49 = vld [vmem:[#allocation14 + $0x40] ss:$8 sps:$4 sm:$0xff]   ;;  %v3166_v50 = vld [vmem:[#allocation14 + $0x54] ss:$8 sps:$4 sm:$0xff]   ;;  %v4238_v51 = vld [vmem:[#allocation14 + $0x50] ss:$8 sps:$4 sm:$0xff]  }
 0x17a   : > { %2802 = vmatpush3.bf16.msra.mxu0 %v3135_v3  ;;  %v610_v25 = vadd.f32 %v609_v22, %v603_v18  ;;  %v4240_v52 = vld [vmem:[#allocation14 + $0x64] ss:$8 sps:$4 sm:$0xff]   ;;  %v4243_v53 = vld [vmem:[#allocation14 + $0x60] ss:$8 sps:$4 sm:$0xff]   ;;  %v4246_v54 = vld [vmem:[#allocation14 + $0x74] ss:$8 sps:$4 sm:$0xff]  }
 0x17b   : > { %2803 = vmatprep.subr.bf16.mxu0 %v3723_v0  ;;  %v4249_v55 = vld [vmem:[#allocation14 + $0x70] ss:$8 sps:$4 sm:$0xff]   ;;  %v4252_v56 = vld [vmem:[#allocation14 + $0x84] ss:$8 sps:$4 sm:$0xff]   ;;  %v4255_v57 = vld [vmem:[#allocation14 + $0x80] ss:$8 sps:$4 sm:$0xff]  }
 0x17c   : > { %v611_v27 = vadd.f32 %v610_v25, %v604_v21  ;;  %v4258_v58 = vld [vmem:[#allocation14 + $0x94] ss:$8 sps:$4 sm:$0xff]   ;;  %v4261_v60 = vld [vmem:[#allocation14 + $0x90] ss:$8 sps:$4 sm:$0xff]   ;;  %v4264_v62 = vld [vmem:[#allocation14 + $0xa4] ss:$8 sps:$4 sm:$0xff]  }
 0x17d   : > { %v4267_v1 = vld [vmem:[#allocation14 + $0xa0] ss:$8 sps:$4 sm:$0xff]   ;;  %v736_v15 = vshrl.u32 %v735_v14, 7  ;;  %s3620_s17 = scalar_lea.vmem %s3619_s28, 32 }
 0x17e   : > { %2804 = vmatpush3.bf16.msra.mxu0 %v3136_v7  ;;  %v612_v29 = vadd.f32 %v611_v27, %v605_v24  ;;  %v747_v21 = vld [vmem:[#allocation7] sm:$0xff]  ;;  %v748_v22 = vld [vmem:[#allocation7 + $0x8] sm:$0xff]  ;;  %v750_v24 = vld [vmem:[#allocation7 + $0x18] sm:$0xff]  ;;  %p3622_p3 = scmp.lt.s32.totalorder %s3620_s17, %s3614_s1 }
 0x17f   : > { %2805 = vmatprep.subr.bf16.mxu0 %v3723_v0 }
 0x180   : > { %v613_v30 = vadd.f32 %v612_v29, %v606_v26  ;;  %p3623_p0 = por %p3622_p3, %p3621_p4 }
 0x182   : > { %2806 = vmatpush3.bf16.msra.mxu0 %v3137_v16  ;;  %v614_v32 = vrot.slane %v613_v30, 4  ;;  %v737_v16 = vsub.s32 0, %v736_v15  ;;  %v4279_v15 = vld [vmem:[#allocation13 + $0x8] sm:$0xff]   ;;  %p3624_p5 = pnand %p3623_p0, %p3617_p9 }
 0x183   : > { %2807 = vmatprep.subr.bf16.mxu0 %v3723_v0 }
 0x184   : > { %v615_v33 = vadd.f32 %v614_v32, %v613_v30 }
 0x186   : > { %2808 = vmatpush3.bf16.msra.mxu0 %v3138_v23  ;;  %v616_v34 = vrot.slane %v615_v33, 2  ;;  %v749_v23 = vld [vmem:[#allocation7 + $0x10] sm:$0xff] }
 0x187   : > { %2809 = vmatprep.subr.bf16.mxu0 %v3723_v0 }
 0x188   : > { %v617_v35 = vadd.f32 %v616_v34, %v615_v33 }
 0x18a   : > { %2810 = vmatpush3.bf16.msra.mxu0 %v3139_v28  ;;  %v618_v36 = vrot.slane %v617_v35, 1 }
 0x18b   : > { %2811 = vmatprep.subr.bf16.mxu0 %v3723_v0 }
 0x18c   : > { %v619_v37 = vadd.f32 %v618_v36, %v617_v35  ;;  %v751_v35 = vld [vmem:[#allocation7 + $0x20] sm:$0xff]  ;;  %v752_v36 = vld [vmem:[#allocation7 + $0x28] sm:$0xff] }
 0x18e   : > { %2812 = vmatpush3.bf16.msra.mxu0 %v3140_v31  ;;  %v636_v38 = vpack.c.bf16 %v619_v37, %v619_v37 }
 0x18f   : > { %1148 = vmatprep.subr.bf16.mxu0 %v3151_v41 }
 0x191   : > { %2814 = vmatmul.mubr.bf16.vlgmr.msra.gmra.mrb[0].mxu0 %v636_v38 }
 0x192   : > { %1149 = vmatpush1.bf16.msra.mxu0 %v3149_v40 }
 0x193   : > { %1150 = vmatprep.subr.bf16.mxu0 %v3154_v42 }
 0x196   : > { %1151 = vmatpush1.bf16.msra.mxu0 %v3152_v43  ;;  %v755_v43 = vld [vmem:[#allocation8] sm:$0xff] }
 0x197   : > { %1152 = vmatprep.subr.bf16.mxu0 %v3157_v44  ;;  %v756_v44 = vld [vmem:[#allocation8 + $0x8] sm:$0xff] }
 0x19a   : > { %1153 = vmatpush1.bf16.msra.mxu0 %v3155_v45 }
 0x19b   : > { %1154 = vmatprep.subr.bf16.mxu0 %v3160_v46 }
 0x19e   : > { %1155 = vmatpush1.bf16.msra.mxu0 %v3158_v47  ;;  %v757_v47 = vld [vmem:[#allocation8 + $0x10] sm:$0xff] }
 0x19f   : > { %1156 = vmatprep.subr.bf16.mxu0 %v3163_v48  ;;  %v758_v48 = vld [vmem:[#allocation8 + $0x18] sm:$0xff] }
 0x1a2   : > { %1157 = vmatpush1.bf16.msra.mxu0 %v3161_v49 }
 0x1a3   : > { %1158 = vmatprep.subr.bf16.mxu0 %v3166_v50 }
 0x1a6   : > { %1159 = vmatpush1.bf16.msra.mxu0 %v4238_v51 }
 0x1a7   : > { %1160 = vmatprep.subr.bf16.mxu0 %v4240_v52 }
 0x1aa   : > { %1161 = vmatpush1.bf16.msra.mxu0 %v4243_v53 }
 0x1ab   : > { %1162 = vmatprep.subr.bf16.mxu0 %v4246_v54 }
 0x1ae   : > { %1163 = vmatpush1.bf16.msra.mxu0 %v4249_v55 }
 0x1af   : > { %1164 = vmatprep.subr.bf16.mxu0 %v4252_v56 }
 0x1b2   : > { %1165 = vmatpush1.bf16.msra.mxu0 %v4255_v57 }
 0x1b3   : > { %1166 = vmatprep.subr.bf16.mxu0 %v4258_v58 }
 0x1b6   : > { %1167 = vmatpush1.bf16.msra.mxu0 %v4261_v60 }
 0x1b7   : > { %1168 = vmatprep.subr.bf16.mxu0 %v4264_v62 }
 0x1ba   : > { %1169 = vmatpush1.bf16.msra.mxu0 %v4267_v1 }
 0x264   : > { %v719_v59 = vpop.f32.mrb[0].mxu0 }
 0x265   : > { %3261 = vrsqrt.f32 %v719_v59  ;;  %v2815_v61 = vpop.f32.mrb[1].mxu0  ;;  %vm727_vm1 = vcmp.eq.f32.partialorder %v719_v59, inf  ;;  %v730_v7 = vand.u32 2147483648, %v719_v59  ;;  %vm729_vm2 = vcmp.eq.f32.partialorder %v719_v59, 0.0 }
 0x266   : > { %v722_v63 = vpop.f32.mrb[2].mxu0  ;;  %v760_v61 = vld [vmem:[#allocation8 + $0x28] sm:$0xff] }
 0x267   : > { %v2816_v0 = vpop.f32.mrb[3].mxu0 }
 0x26f   : > { %v3262_v2 = vpop.eup %3261 }
 0x270   : > { %v726_v3 = vmul.f32 %v3262_v2, %v719_v59 }
 0x272   : > { %v728_v9 = vsel %vm727_vm1, %v719_v59, %v726_v3  ;;  %v759_v59 = vld [vmem:[#allocation8 + $0x20] sm:$0xff]  ;;  %v761_v3 = vld [vmem:[#allocation8 + $0x30] sm:$0xff] }
 0x273   : > { %v731_v10 = vsel %vm729_vm2, %v730_v7, %v728_v9  ;;  %v762_v7 = vld [vmem:[#allocation8 + $0x38] sm:$0xff] }
 0x274   : > { %v732_v11 = vadd.f32 1e-06, %v731_v10 }
 0x276   : > { %3263 = vrcp.f32 %v732_v11 }
 0x280   : > { %v3264_v18 = vpop.eup %3263 }
 0x281   : > { %v738_v19 = vrot.slane %v3264_v18, %v737_v16  ;;  %v4281_v16 = vld [vmem:[#allocation13 + $0x10] sm:$0xff]   ;;  %v4285_v18 = vld [vmem:[#allocation13 + $0x18] sm:$0xff]  }
 0x283   : > { %v739_v25 = vmul.f32 %v738_v19, %v4196_v4  ;;  %v740_v26 = vmul.f32 %v738_v19, %v4199_v5  ;;  %v741_v27 = vmul.f32 %v738_v19, %v4202_v6  ;;  %v742_v28 = vmul.f32 %v738_v19, %v4205_v8  ;;  %v753_v8 = vld [vmem:[#allocation7 + $0x30] sm:$0xff] }
 0x284   : > { %v743_v29 = vmul.f32 %v738_v19, %v4214_v12  ;;  %v744_v30 = vmul.f32 %v738_v19, %v4217_v13  ;;  %v745_v38 = vmul.f32 %v738_v19, %v4222_v17  ;;  %v746_v6 = vmul.f32 %v738_v19, %v4227_v20  ;;  %v754_v12 = vld [vmem:[#allocation7 + $0x38] sm:$0xff]  ;;  %v4287_v19 = vld [vmem:[#allocation13 + $0x20] sm:$0xff]  }
 0x285   : > { %v763_v31 = vmul.f32 %v747_v21, %v739_v25  ;;  %v764_v32 = vmul.f32 %v748_v22, %v740_v26  ;;  %v765_v33 = vmul.f32 %v749_v23, %v741_v27  ;;  %v766_v34 = vmul.f32 %v750_v24, %v742_v28  ;;  %v4291_v21 = vld [vmem:[#allocation13 + $0x28] sm:$0xff]   ;;  %v4293_v22 = vld [vmem:[#allocation13 + $0x30] sm:$0xff]   ;;  %v4297_v23 = vld [vmem:[#allocation13 + $0x38] sm:$0xff]  }
 0x286   : > { %v767_v5 = vmul.f32 %v751_v35, %v743_v29  ;;  %v768_v40 = vmul.f32 %v752_v36, %v744_v30  ;;  %v769_v41 = vmul.f32 %v753_v8, %v745_v38  ;;  %v770_v42 = vmul.f32 %v754_v12, %v746_v6  ;;  %v4300_v24 = vld [vmem:[#allocation14 + $0xb0] ss:$8 sps:$4 sm:$0xff]  }
 0x287   : > { %v795_v37 = vpack.c.bf16 %v764_v32, %v763_v31  ;;  %v796_v4 = vpack.c.bf16 %v766_v34, %v765_v33  ;;  %v771_v46 = vmul.f32 %v755_v43, %v739_v25  ;;  %v772_v17 = vmul.f32 %v756_v44, %v740_v26  ;;  %v4302_v25 = vld [vmem:[#allocation14 + $0xb4] ss:$8 sps:$4 sm:$0xff]   ;;  %v4304_v26 = vld [vmem:[#allocation14 + $0xc4] ss:$8 sps:$4 sm:$0xff]   ;;  %v4320_v31 = vld [vmem:[#allocation14 + $0xe0] ss:$8 sps:$4 sm:$0xff]  }
 0x288   : > { %v797_v13 = vpack.c.bf16 %v768_v40, %v767_v5  ;;  %v798_v45 = vpack.c.bf16 %v770_v42, %v769_v41  ;;  %v773_v20 = vmul.f32 %v757_v47, %v741_v27  ;;  %v774_v50 = vmul.f32 %v758_v48, %v742_v28  ;;  %1170 = vmatprep.subr.bf16.mxu0 %v4302_v25  ;;  %v4308_v27 = vld [vmem:[#allocation14 + $0xc0] ss:$8 sps:$4 sm:$0xff]   ;;  %v4312_v28 = vld [vmem:[#allocation14 + $0xd0] ss:$8 sps:$4 sm:$0xff]   ;;  %v4326_v33 = vld [vmem:[#allocation14 + $0xf4] ss:$8 sps:$4 sm:$0xff]  }
 0x289   : > { %2817 = vmatprep.subr.bf16.mxu1 %v795_v37  ;;  %v799_v49 = vpack.c.bf16 %v772_v17, %v771_v46  ;;  %v775_v0 = vmul.f32 %v759_v59, %v743_v29  ;;  %v776_v2 = vmul.f32 %v760_v61, %v744_v30  ;;  %v777_v10 = vmul.f32 %v761_v3, %v745_v38  ;;  %v4314_v29 = vld [vmem:[#allocation14 + $0xd4] ss:$8 sps:$4 sm:$0xff]   ;;  %v4316_v30 = vld [vmem:[#allocation14 + $0xe4] ss:$8 sps:$4 sm:$0xff]   ;;  %v4324_v32 = vld [vmem:[#allocation14 + $0xf0] ss:$8 sps:$4 sm:$0xff]  }
 0x28a   : > { %2818 = vmatpush3.bf16.msra.mxu1 %v795_v37  ;;  %v800_v63 = vpack.c.bf16 %v774_v50, %v773_v20  ;;  %v778_v11 = vmul.f32 %v762_v7, %v746_v6  ;;  %1171 = vmatpush1.bf16.msra.mxu0 %v4300_v24  ;;  %v4331_v59 = vld [vmem:[#allocation16] sm:$0xff]   ;;  %v4340_v3 = vld [vmem:[#allocation11 + $0x8] sm:$0xff] }
 0x28b   : > { %2819 = vmatprep.subr.bf16.mxu1 %v796_v4  ;;  %v801_v9 = vpack.c.bf16 %v776_v2, %v775_v0  ;;  %1172 = vmatprep.subr.bf16.mxu0 %v4304_v26  ;;  %v4334_v61 = vld [vmem:[#allocation10] sm:$0xff]  ;;  %v4338_v2 = vld [vmem:[#allocation10 + $0x8] sm:$0xff] }
 0x28c   : > { %v802_v14 = vpack.c.bf16 %v778_v11, %v777_v10 }
 0x28e   : > { %2820 = vmatpush3.bf16.msra.mxu1 %v796_v4  ;;  %1173 = vmatpush1.bf16.msra.mxu0 %v4308_v27 }
 0x28f   : > { %2821 = vmatprep.subr.bf16.mxu1 %v797_v13  ;;  %1174 = vmatprep.subr.bf16.mxu0 %v4314_v29 }
 0x292   : > { %2822 = vmatpush3.bf16.msra.mxu1 %v797_v13  ;;  %1175 = vmatpush1.bf16.msra.mxu0 %v4312_v28 }
 0x293   : > { %2823 = vmatprep.subr.bf16.mxu1 %v798_v45  ;;  %1176 = vmatprep.subr.bf16.mxu0 %v4316_v30 }
 0x296   : > { %2824 = vmatpush3.bf16.msra.mxu1 %v798_v45  ;;  %1177 = vmatpush1.bf16.msra.mxu0 %v4320_v31 }
 0x297   : > { %2825 = vmatprep.subr.bf16.mxu1 %v799_v49  ;;  %1178 = vmatprep.subr.bf16.mxu0 %v4326_v33 }
 0x29a   : > { %2826 = vmatpush3.bf16.msra.mxu1 %v799_v49  ;;  %1179 = vmatpush1.bf16.msra.mxu0 %v4324_v32 }
 0x29b   : > { %2827 = vmatprep.subr.bf16.mxu1 %v800_v63 }
 0x29e   : > { %2828 = vmatpush3.bf16.msra.mxu1 %v800_v63  ;;  %v4336_v63 = vld [vmem:[#allocation11] sm:$0xff] }
 0x29f   : > { %2829 = vmatprep.subr.bf16.mxu1 %v801_v9 }
 0x2a2   : > { %2830 = vmatpush3.bf16.msra.mxu1 %v801_v9 }
 0x2a3   : > { %2831 = vmatprep.subr.bf16.mxu1 %v802_v14 }
 0x2a6   : > { %2832 = vmatpush3.bf16.msra.mxu1 %v802_v14 }
 0x2a9   : > { %2834 = vmatmul.mubr.bf16.vlgmr.msra.gmra.mrb[0].mxu1 %v4279_v15 }
 0x2aa   : > { %2837 = vmatprep.mubr.bf16.mxu1 %v4281_v16 }
 0x2b1   : > { %2838 = vmatmul.mubr.bf16.gmra.mrb[4].mxu1 %v4285_v18 }
 0x2b2   : > { %2841 = vmatprep.mubr.bf16.mxu1 %v4287_v19 }
 0x2b9   : > { %2842 = vmatmul.mubr.bf16.gmra.mrb[8].mxu1 %v4291_v21 }
 0x2ba   : > { %2845 = vmatprep.mubr.bf16.mxu1 %v4293_v22 }
 0x2c1   : > { %2846 = vmatmul.mubr.bf16.gmra.mrb[12].mxu1 %v4297_v23 }
 0x2c2   : > { %2865 = vmatprep.mubr.bf16.mxu1 %v4331_v59 }
 0x37c   : > { %v2835_v34 = vpop.f32.mrb[0].mxu1 }
 0x37d   : > { %v885_v35 = vpop.f32.mrb[1].mxu1 }
 0x37e   : > { %v2836_v36 = vpop.f32.mrb[2].mxu1 }
 0x37f   : > { %v982_v37 = vpack.c.bf16 %v2836_v36, %v2835_v34  ;;  %v888_v38 = vpop.f32.mrb[3].mxu1 }
 0x380   : > { %v980_v4 = vpack.c.bf16 %v888_v38, %v885_v35 }
 0x384   : > { %v2839_v5 = vpop.f32.mrb[4].mxu1 }
 0x385   : > { %v901_v40 = vpop.f32.mrb[5].mxu1 }
 0x386   : > { %v2840_v6 = vpop.f32.mrb[6].mxu1 }
 0x387   : > { %v986_v8 = vpack.c.bf16 %v2840_v6, %v2839_v5  ;;  %v904_v12 = vpop.f32.mrb[7].mxu1 }
 0x388   : > { %v984_v13 = vpack.c.bf16 %v904_v12, %v901_v40  ;;  %v4352_v12 = vld [vmem:[#allocation11 + $0x10] sm:$0xff] }
 0x389   : > { %4802 = vst [vmem:[#allocation33_spill] sm:$0xff] %v4352_v12 }
 0x38c   : > { %v2843_v41 = vpop.f32.mrb[8].mxu1 }
 0x38d   : > { %v917_v42 = vpop.f32.mrb[9].mxu1 }
 0x38e   : > { %v2844_v43 = vpop.f32.mrb[10].mxu1 }
 0x38f   : > { %v983_v44 = vpack.c.bf16 %v2844_v43, %v2843_v41  ;;  %v920_v45 = vpop.f32.mrb[11].mxu1  ;;  %v4354_v41 = vld [vmem:[#allocation10 + $0x18] sm:$0xff] }
 0x390   : > { %v981_v46 = vpack.c.bf16 %v920_v45, %v917_v42  ;;  %4803 = vst [vmem:[#allocation34_spill] sm:$0xff] %v4354_v41  ;;  %v4356_v42 = vld [vmem:[#allocation11 + $0x18] sm:$0xff] }
 0x391   : > { %4804 = vst [vmem:[#allocation35_spill] sm:$0xff] %v4356_v42 }
 0x392   : > { %1180 = vmatprep.mubr.bf16.mxu0 %v981_v46 }
 0x393   : > { %1181 = vmatmul.mubr.bf16.vlgmr.msra.gmra.mrb[4].mxu0 %v980_v4 }
 0x394   : > { %1190 = vmatprep.mubr.bf16.mxu0 %v983_v44  ;;  %v2847_v17 = vpop.f32.mrb[12].mxu1 }
 0x395   : > { %v933_v47 = vpop.f32.mrb[13].mxu1 }
 0x396   : > { %v2848_v48 = vpop.f32.mrb[14].mxu1 }
 0x397   : > { %v987_v49 = vpack.c.bf16 %v2848_v48, %v2847_v17  ;;  %v936_v20 = vpop.f32.mrb[15].mxu1 }
 0x398   : > { %v985_v50 = vpack.c.bf16 %v936_v20, %v933_v47 }
 0x39b   : > { %1191 = vmatmul.mubr.bf16.gmra.mrb[8].mxu0 %v982_v37 }
 0x39c   : > { %1200 = vmatprep.mubr.bf16.mxu0 %v985_v50 }
 0x3a3   : > { %1201 = vmatmul.mubr.bf16.gmra.mrb[12].mxu0 %v984_v13 }
 0x3a4   : > { %1210 = vmatprep.mubr.bf16.mxu0 %v987_v49 }
 0x3ab   : > { %1211 = vmatmul.mubr.bf16.gmra.mrb[16].mxu0 %v986_v8  ;;  %v4350_v8 = vld [vmem:[#allocation10 + $0x10] sm:$0xff] }
 0x3ac   : > { %2897 = vmatprep.mubr.bf16.mxu0 %v4235_v39 }
 0x466   : > { %v1182_v0 = vpop.f32.mrb[4].mxu0 }
 0x467   : > { %v1237_v7 = vmul.f32 %v4334_v61, %v1182_v0  ;;  %v1261_v9 = vmul.f32 %v4336_v63, %v1182_v0  ;;  %v1184_v10 = vpop.f32.mrb[5].mxu0 }
 0x468   : > { %v1245_v39 = vmul.f32 %v4336_v63, %v1184_v10  ;;  %v1269_v11 = vmul.f32 %v4334_v61, %v1184_v10  ;;  %v1186_v14 = vpop.f32.mrb[6].mxu0 }
 0x469   : > { %v1238_v34 = vmul.f32 %v4338_v2, %v1186_v14  ;;  %v1262_v35 = vmul.f32 %v4340_v3, %v1186_v14  ;;  %v1188_v36 = vpop.f32.mrb[7].mxu0 }
 0x46a   : > { %v1253_v37 = vsub.f32 %v1237_v7, %v1245_v39  ;;  %v1277_v38 = vadd.f32 %v1269_v11, %v1261_v9  ;;  %v1246_v4 = vmul.f32 %v4340_v3, %v1188_v36  ;;  %v1270_v5 = vmul.f32 %v4338_v2, %v1188_v36 }
 0x46c   : > { %v1254_v40 = vsub.f32 %v1238_v34, %v1246_v4  ;;  %v1278_v6 = vadd.f32 %v1270_v5, %v1262_v35  ;;  %v4368_v34 = vld [vmem:[#allocation10 + $0x20] sm:$0xff] }
 0x46d   : > { %4805 = vst [vmem:[#allocation36_spill] sm:$0xff] %v4368_v34  ;;  %v4370_v35 = vld [vmem:[#allocation11 + $0x20] sm:$0xff] }
 0x46e   : > { %v1192_v13 = vpop.f32.mrb[8].mxu0  ;;  %v1301_v43 = vpack.c.bf16 %v1254_v40, %v1253_v37  ;;  %v4358_v44 = vpack.c.bf16 %v1278_v6, %v1277_v38  ;;  %4806 = vst [vmem:[#allocation37_spill] sm:$0xff] %v4370_v35  ;;  %v4372_v37 = vld [vmem:[#allocation10 + $0x28] sm:$0xff] }
 0x46f   : > { %v1239_v45 = vmul.f32 %v4350_v8, %v1192_v13  ;;  %v1263_v46 = vmul.f32 %v4352_v12, %v1192_v13  ;;  %v1194_v17 = vpop.f32.mrb[9].mxu0  ;;  %4807 = vst [vmem:[#allocation38_spill] sm:$0xff] %v4372_v37  ;;  %v4374_v38 = vld [vmem:[#allocation11 + $0x28] sm:$0xff] }
 0x470   : > { %v1247_v47 = vmul.f32 %v4352_v12, %v1194_v17  ;;  %v1271_v48 = vmul.f32 %v4350_v8, %v1194_v17  ;;  %v1196_v49 = vpop.f32.mrb[10].mxu0  ;;  %2849 = vmatprep.subr.bf16.mxu1 %v1301_v43  ;;  %4808 = vst [vmem:[#allocation39_spill] sm:$0xff] %v4374_v38 }
 0x471   : > { %v1240_v20 = vmul.f32 %v4354_v41, %v1196_v49  ;;  %v1264_v50 = vmul.f32 %v4356_v42, %v1196_v49  ;;  %v1198_v0 = vpop.f32.mrb[11].mxu0  ;;  %2850 = vmatpush3.bf16.msra.mxu1 %v1301_v43 }
 0x472   : > { %v1255_v7 = vsub.f32 %v1239_v45, %v1247_v47  ;;  %v1279_v9 = vadd.f32 %v1271_v48, %v1263_v46  ;;  %v1248_v10 = vmul.f32 %v4356_v42, %v1198_v0  ;;  %v1272_v39 = vmul.f32 %v4354_v41, %v1198_v0 }
 0x474   : > { %v1256_v11 = vsub.f32 %v1240_v20, %v1248_v10  ;;  %v1280_v14 = vadd.f32 %v1272_v39, %v1264_v50  ;;  %v4384_v10 = vld [vmem:[#allocation10 + $0x30] sm:$0xff] }
 0x475   : > { %4809 = vst [vmem:[#allocation40_spill] sm:$0xff] %v4384_v10  ;;  %v4386_v39 = vld [vmem:[#allocation11 + $0x30] sm:$0xff] }
 0x476   : > { %v1202_v36 = vpop.f32.mrb[12].mxu0  ;;  %v1302_v4 = vpack.c.bf16 %v1256_v11, %v1255_v7  ;;  %v1306_v5 = vpack.c.bf16 %v1280_v14, %v1279_v9  ;;  %4810 = vst [vmem:[#allocation41_spill] sm:$0xff] %v4386_v39  ;;  %v4388_v14 = vld [vmem:[#allocation10 + $0x38] sm:$0xff] }
 0x477   : > { %v1241_v40 = vmul.f32 %v4368_v34, %v1202_v36  ;;  %v1265_v6 = vmul.f32 %v4370_v35, %v1202_v36  ;;  %v1204_v13 = vpop.f32.mrb[13].mxu0  ;;  %4811 = vst [vmem:[#allocation42_spill] sm:$0xff] %v4388_v14  ;;  %v4390_v36 = vld [vmem:[#allocation11 + $0x38] sm:$0xff] }
 0x478   : > { %v1249_v43 = vmul.f32 %v4370_v35, %v1204_v13  ;;  %v1273_v45 = vmul.f32 %v4368_v34, %v1204_v13  ;;  %v1206_v46 = vpop.f32.mrb[14].mxu0  ;;  %2851 = vmatprep.subr.bf16.mxu1 %v1302_v4  ;;  %4812 = vst [vmem:[#allocation43_spill] sm:$0xff] %v4390_v36 }
 0x479   : > { %v1242_v17 = vmul.f32 %v4372_v37, %v1206_v46  ;;  %v1266_v47 = vmul.f32 %v4374_v38, %v1206_v46  ;;  %v1208_v48 = vpop.f32.mrb[15].mxu0  ;;  %2852 = vmatpush3.bf16.msra.mxu1 %v1302_v4 }
 0x47a   : > { %v1257_v49 = vsub.f32 %v1241_v40, %v1249_v43  ;;  %v1281_v20 = vadd.f32 %v1273_v45, %v1265_v6  ;;  %v1250_v50 = vmul.f32 %v4374_v38, %v1208_v48  ;;  %v1274_v0 = vmul.f32 %v4372_v37, %v1208_v48 }
 0x47c   : > { %v1258_v7 = vsub.f32 %v1242_v17, %v1250_v50  ;;  %v1282_v9 = vadd.f32 %v1274_v0, %v1266_v47 }
 0x47e   : > { %v1212_v11 = vpop.f32.mrb[16].mxu0  ;;  %v1303_v13 = vpack.c.bf16 %v1258_v7, %v1257_v49  ;;  %v1307_v46 = vpack.c.bf16 %v1282_v9, %v1281_v20 }
 0x47f   : > { %v1243_v4 = vmul.f32 %v4384_v10, %v1212_v11  ;;  %v1267_v40 = vmul.f32 %v4386_v39, %v1212_v11  ;;  %v1214_v6 = vpop.f32.mrb[17].mxu0 }
 0x480   : > { %v1251_v43 = vmul.f32 %v4386_v39, %v1214_v6  ;;  %v1275_v45 = vmul.f32 %v4384_v10, %v1214_v6  ;;  %v1216_v17 = vpop.f32.mrb[18].mxu0  ;;  %2853 = vmatprep.subr.bf16.mxu1 %v1303_v13  ;;  %v4408_v6 = vld [vmem:[#allocation17] ss:$8 sps:$4 sm:$0xff]   ;;  %v1740_v10 = vld [vmem:[#allocation8 + $0x58] sm:$0xff] }
 0x481   : > { %v1244_v47 = vmul.f32 %v4388_v14, %v1216_v17  ;;  %v1268_v48 = vmul.f32 %v4390_v36, %v1216_v17  ;;  %v1218_v50 = vpop.f32.mrb[19].mxu0  ;;  %2854 = vmatpush3.bf16.msra.mxu1 %v1303_v13  ;;  %v4402_v13 = vld [vmem:[#allocation17 + $0x4] ss:$8 sps:$4 sm:$0xff]   ;;  %4816 = vst [vmem:[#allocation47_spill] sm:$0xff] %v4408_v6  ;;  %v4434_v17 = vld [vmem:[#allocation17 + $0x30] ss:$8 sps:$4 sm:$0xff]  }
 0x482   : > { %v1259_v0 = vsub.f32 %v1243_v4, %v1251_v43  ;;  %v1283_v49 = vadd.f32 %v1275_v45, %v1267_v40  ;;  %v1252_v20 = vmul.f32 %v4390_v36, %v1218_v50  ;;  %v1276_v7 = vmul.f32 %v4388_v14, %v1218_v50  ;;  %4813 = vst [vmem:[#allocation44_spill] sm:$0xff] %v4402_v13  ;;  %v4404_v4 = vld [vmem:[#allocation16 + $0x8] sm:$0xff]   ;;  %v4406_v40 = vld [vmem:[#allocation16 + $0x10] sm:$0xff]   ;;  %v1731_v14 = vld [vmem:[#allocation7 + $0x58] sm:$0xff] }
 0x483   : > { %4814 = vst [vmem:[#allocation45_spill] sm:$0xff] %v4404_v4  ;;  %4815 = vst [vmem:[#allocation46_spill] sm:$0xff] %v4406_v40  ;;  %v4426_v43 = vld [vmem:[#allocation17 + $0x20] ss:$8 sps:$4 sm:$0xff]   ;;  %v4429_v45 = vld [vmem:[#allocation17 + $0x34] ss:$8 sps:$4 sm:$0xff]  }
 0x484   : > { %v1260_v9 = vsub.f32 %v1244_v47, %v1252_v20  ;;  %v1284_v11 = vadd.f32 %v1276_v7, %v1268_v48  ;;  %4822 = vst [vmem:[#allocation53_spill] sm:$0xff] %v4426_v43  ;;  %4823 = vst [vmem:[#allocation54_spill] sm:$0xff] %v4429_v45  ;;  %v4437_v47 = vld [vmem:[#allocation17 + $0x44] ss:$8 sps:$4 sm:$0xff]   ;;  %v4441_v50 = vld [vmem:[#allocation16 + $0x30] sm:$0xff]  }
 0x485   : > { %4824 = vst [vmem:[#allocation55_spill] sm:$0xff] %v4434_v17  ;;  %4825 = vst [vmem:[#allocation56_spill] sm:$0xff] %v4437_v47  ;;  %v4439_v48 = vld [vmem:[#allocation16 + $0x28] sm:$0xff]   ;;  %v4452_v20 = vld [vmem:[#allocation17 + $0x50] ss:$8 sps:$4 sm:$0xff]  }
 0x486   : > { %v1304_v38 = vpack.c.bf16 %v1260_v9, %v1259_v0  ;;  %v1308_v39 = vpack.c.bf16 %v1284_v11, %v1283_v49  ;;  %4826 = vst [vmem:[#allocation57_spill] sm:$0xff] %v4439_v48  ;;  %4827 = vst [vmem:[#allocation58_spill] sm:$0xff] %v4441_v50  ;;  %v4444_v0 = vld [vmem:[#allocation17 + $0x40] ss:$8 sps:$4 sm:$0xff]   ;;  %v4447_v49 = vld [vmem:[#allocation17 + $0x54] ss:$8 sps:$4 sm:$0xff]  }
 0x487   : > { %4828 = vst [vmem:[#allocation59_spill] sm:$0xff] %v4444_v0  ;;  %4829 = vst [vmem:[#allocation60_spill] sm:$0xff] %v4447_v49  ;;  %v4455_v7 = vld [vmem:[#allocation17 + $0x64] ss:$8 sps:$4 sm:$0xff]   ;;  %v4457_v9 = vld [vmem:[#allocation16 + $0x38] sm:$0xff]  }
 0x488   : > { %2855 = vmatprep.subr.bf16.mxu1 %v1304_v38  ;;  %4830 = vst [vmem:[#allocation61_spill] sm:$0xff] %v4452_v20  ;;  %4831 = vst [vmem:[#allocation62_spill] sm:$0xff] %v4455_v7  ;;  %v4460_v11 = vld [vmem:[#allocation17 + $0x60] ss:$8 sps:$4 sm:$0xff]  }
 0x489   : > { %2856 = vmatpush3.bf16.msra.mxu1 %v1304_v38  ;;  %v4411_v38 = vld [vmem:[#allocation17 + $0x14] ss:$8 sps:$4 sm:$0xff]   ;;  %4832 = vst [vmem:[#allocation63_spill] sm:$0xff] %v4457_v9  ;;  %4833 = vst [vmem:[#allocation64_spill] sm:$0xff] %v4460_v11 }
 0x48a   : > { %2857 = vmatprep.subr.bf16.mxu1 %v4358_v44  ;;  %4817 = vst [vmem:[#allocation48_spill] sm:$0xff] %v4411_v38 }
 0x48d   : > { %2858 = vmatpush3.bf16.msra.mxu1 %v4358_v44  ;;  %v4416_v44 = vld [vmem:[#allocation17 + $0x10] ss:$8 sps:$4 sm:$0xff]  }
 0x48e   : > { %2859 = vmatprep.subr.bf16.mxu1 %v1306_v5  ;;  %4818 = vst [vmem:[#allocation49_spill] sm:$0xff] %v4416_v44 }
 0x491   : > { %2860 = vmatpush3.bf16.msra.mxu1 %v1306_v5  ;;  %v4419_v5 = vld [vmem:[#allocation17 + $0x24] ss:$8 sps:$4 sm:$0xff]  }
 0x492   : > { %2861 = vmatprep.subr.bf16.mxu1 %v1307_v46  ;;  %4819 = vst [vmem:[#allocation50_spill] sm:$0xff] %v4419_v5 }
 0x495   : > { %2862 = vmatpush3.bf16.msra.mxu1 %v1307_v46  ;;  %v4423_v46 = vld [vmem:[#allocation16 + $0x20] sm:$0xff]  }
 0x496   : > { %2863 = vmatprep.subr.bf16.mxu1 %v1308_v39  ;;  %4821 = vst [vmem:[#allocation52_spill] sm:$0xff] %v4423_v46 }
 0x499   : > { %2864 = vmatpush3.bf16.msra.mxu1 %v1308_v39  ;;  %v4421_v39 = vld [vmem:[#allocation16 + $0x18] sm:$0xff]  }
 0x49a   : > { %1654 = vmatprep.subr.bf16.mxu1 %v4402_v13  ;;  %4820 = vst [vmem:[#allocation51_spill] sm:$0xff] %v4421_v39  ;;  %v1739_v13 = vld [vmem:[#allocation8 + $0x50] sm:$0xff] }
 0x49c   : > { %2866 = vmatmul.mubr.bf16.vlgmr.msra.gmra.mrb[16].mxu1 %v4404_v4 }
 0x49d   : > { %2869 = vmatprep.mubr.bf16.mxu1 %v4406_v40  ;;  %1655 = vmatpush1.bf16.msra.mxu1 %v4408_v6 }
 0x49e   : > { %1656 = vmatprep.subr.bf16.mxu1 %v4411_v38 }
 0x4a1   : > { %1657 = vmatpush1.bf16.msra.mxu1 %v4416_v44 }
 0x4a2   : > { %1658 = vmatprep.subr.bf16.mxu1 %v4419_v5 }
 0x4a4   : > { %2870 = vmatmul.mubr.bf16.gmra.mrb[20].mxu1 %v4421_v39 }
 0x4a5   : > { %2873 = vmatprep.mubr.bf16.mxu1 %v4423_v46  ;;  %1659 = vmatpush1.bf16.msra.mxu1 %v4426_v43 }
 0x4a6   : > { %1660 = vmatprep.subr.bf16.mxu1 %v4429_v45 }
 0x4a9   : > { %1661 = vmatpush1.bf16.msra.mxu1 %v4434_v17 }
 0x4aa   : > { %1662 = vmatprep.subr.bf16.mxu1 %v4437_v47  ;;  %v4463_v47 = vld [vmem:[#allocation17 + $0x74] ss:$8 sps:$4 sm:$0xff]  }
 0x4ab   : > { %4834 = vst [vmem:[#allocation65_spill] sm:$0xff] %v4463_v47 }
 0x4ac   : > { %2874 = vmatmul.mubr.bf16.gmra.mrb[24].mxu1 %v4439_v48 }
 0x4ad   : > { %2877 = vmatprep.mubr.bf16.mxu1 %v4441_v50  ;;  %1663 = vmatpush1.bf16.msra.mxu1 %v4444_v0  ;;  %v4467_v0 = vld [vmem:[#allocation17 + $0x70] ss:$8 sps:$4 sm:$0xff]   ;;  %v4473_v50 = vld [vmem:[#allocation17 + $0x80] ss:$8 sps:$4 sm:$0xff]  }
 0x4ae   : > { %1664 = vmatprep.subr.bf16.mxu1 %v4447_v49  ;;  %4835 = vst [vmem:[#allocation66_spill] sm:$0xff] %v4467_v0  ;;  %v4470_v49 = vld [vmem:[#allocation17 + $0x84] ss:$8 sps:$4 sm:$0xff]   ;;  %4837 = vst [vmem:[#allocation68_spill] sm:$0xff] %v4473_v50 }
 0x4af   : > { %4836 = vst [vmem:[#allocation67_spill] sm:$0xff] %v4470_v49 }
 0x4b1   : > { %1665 = vmatpush1.bf16.msra.mxu1 %v4452_v20  ;;  %v4476_v20 = vld [vmem:[#allocation17 + $0x94] ss:$8 sps:$4 sm:$0xff]  }
 0x4b2   : > { %1666 = vmatprep.subr.bf16.mxu1 %v4455_v7  ;;  %4838 = vst [vmem:[#allocation69_spill] sm:$0xff] %v4476_v20  ;;  %v4479_v7 = vld [vmem:[#allocation17 + $0x90] ss:$8 sps:$4 sm:$0xff]  }
 0x4b3   : > { %4839 = vst [vmem:[#allocation70_spill] sm:$0xff] %v4479_v7 }
 0x4b4   : > { %2878 = vmatmul.mubr.bf16.gmra.mrb[28].mxu1 %v4457_v9  ;;  %v4493_v9 = vld [vmem:[#allocation17 + $0xc4] ss:$8 sps:$4 sm:$0xff]  }
 0x4b5   : > { %1667 = vmatpush1.bf16.msra.mxu1 %v4460_v11  ;;  %v4482_v11 = vld [vmem:[#allocation17 + $0xa4] ss:$8 sps:$4 sm:$0xff]   ;;  %4844 = vst [vmem:[#allocation75_spill] sm:$0xff] %v4493_v9 }
 0x4b6   : > { %1668 = vmatprep.subr.bf16.mxu1 %v4463_v47  ;;  %4840 = vst [vmem:[#allocation71_spill] sm:$0xff] %v4482_v11  ;;  %v4485_v47 = vld [vmem:[#allocation17 + $0xa0] ss:$8 sps:$4 sm:$0xff]  }
 0x4b7   : > { %4841 = vst [vmem:[#allocation72_spill] sm:$0xff] %v4485_v47 }
 0x4b9   : > { %1669 = vmatpush1.bf16.msra.mxu1 %v4467_v0  ;;  %v4489_v0 = vld [vmem:[#allocation17 + $0xb0] ss:$8 sps:$4 sm:$0xff]  }
 0x4ba   : > { %1670 = vmatprep.subr.bf16.mxu1 %v4470_v49  ;;  %4842 = vst [vmem:[#allocation73_spill] sm:$0xff] %v4489_v0  ;;  %v4491_v49 = vld [vmem:[#allocation17 + $0xb4] ss:$8 sps:$4 sm:$0xff]  }
 0x4bb   : > { %4843 = vst [vmem:[#allocation74_spill] sm:$0xff] %v4491_v49 }
 0x4bd   : > { %1671 = vmatpush1.bf16.msra.mxu1 %v4473_v50  ;;  %v4509_v50 = vld [vmem:[#allocation17 + $0xe0] ss:$8 sps:$4 sm:$0xff]  }
 0x4be   : > { %1672 = vmatprep.subr.bf16.mxu1 %v4476_v20  ;;  %v4497_v20 = vld [vmem:[#allocation17 + $0xc0] ss:$8 sps:$4 sm:$0xff]   ;;  %4849 = vst [vmem:[#allocation80_spill] sm:$0xff] %v4509_v50 }
 0x4bf   : > { %4845 = vst [vmem:[#allocation76_spill] sm:$0xff] %v4497_v20 }
 0x4c1   : > { %1673 = vmatpush1.bf16.msra.mxu1 %v4479_v7  ;;  %v4501_v7 = vld [vmem:[#allocation17 + $0xd0] ss:$8 sps:$4 sm:$0xff]  }
 0x4c2   : > { %1674 = vmatprep.subr.bf16.mxu1 %v4482_v11  ;;  %4846 = vst [vmem:[#allocation77_spill] sm:$0xff] %v4501_v7  ;;  %v4503_v11 = vld [vmem:[#allocation17 + $0xd4] ss:$8 sps:$4 sm:$0xff]  }
 0x4c3   : > { %4847 = vst [vmem:[#allocation78_spill] sm:$0xff] %v4503_v11 }
 0x4c5   : > { %1675 = vmatpush1.bf16.msra.mxu1 %v4485_v47  ;;  %v4505_v47 = vld [vmem:[#allocation17 + $0xe4] ss:$8 sps:$4 sm:$0xff]  }
 0x4c6   : > { %1676 = vmatprep.subr.bf16.mxu1 %v4491_v49  ;;  %4848 = vst [vmem:[#allocation79_spill] sm:$0xff] %v4505_v47 }
 0x4c9   : > { %1677 = vmatpush1.bf16.msra.mxu1 %v4489_v0  ;;  %v4513_v0 = vld [vmem:[#allocation17 + $0xf0] ss:$8 sps:$4 sm:$0xff]  }
 0x4ca   : > { %1678 = vmatprep.subr.bf16.mxu1 %v4493_v9  ;;  %4850 = vst [vmem:[#allocation81_spill] sm:$0xff] %v4513_v0  ;;  %v4515_v9 = vld [vmem:[#allocation17 + $0xf4] ss:$8 sps:$4 sm:$0xff]  }
 0x4cb   : > { %4851 = vst [vmem:[#allocation82_spill] sm:$0xff] %v4515_v9 }
 0x4cd   : > { %1679 = vmatpush1.bf16.msra.mxu1 %v4497_v20 }
 0x4ce   : > { %1680 = vmatprep.subr.bf16.mxu1 %v4503_v11 }
 0x4d1   : > { %1681 = vmatpush1.bf16.msra.mxu1 %v4501_v7 }
 0x4d2   : > { %1682 = vmatprep.subr.bf16.mxu1 %v4505_v47 }
 0x4d5   : > { %1683 = vmatpush1.bf16.msra.mxu1 %v4509_v50 }
 0x4d6   : > { %1684 = vmatprep.subr.bf16.mxu1 %v4515_v9 }
 0x4d9   : > { %1685 = vmatpush1.bf16.msra.mxu1 %v4513_v0 }
 0x56f   : > { %v2867_v20 = vpop.f32.mrb[16].mxu1 }
 0x570   : > { %v1391_v49 = vpop.f32.mrb[17].mxu1 }
 0x571   : > { %v2868_v48 = vpop.f32.mrb[18].mxu1 }
 0x572   : > { %v1488_v11 = vpack.c.bf16 %v2868_v48, %v2867_v20  ;;  %v1394_v17 = vpop.f32.mrb[19].mxu1 }
 0x573   : > { %v1486_v7 = vpack.c.bf16 %v1394_v17, %v1391_v49 }
 0x577   : > { %v2871_v45 = vpop.f32.mrb[20].mxu1 }
 0x578   : > { %v1407_v43 = vpop.f32.mrb[21].mxu1 }
 0x579   : > { %v2872_v46 = vpop.f32.mrb[22].mxu1 }
 0x57a   : > { %v1492_v47 = vpack.c.bf16 %v2872_v46, %v2871_v45  ;;  %v1410_v39 = vpop.f32.mrb[23].mxu1 }
 0x57b   : > { %v1490_v50 = vpack.c.bf16 %v1410_v39, %v1407_v43  ;;  %v1728_v39 = vld [vmem:[#allocation7 + $0x40] sm:$0xff] }
 0x57f   : > { %v2875_v5 = vpop.f32.mrb[24].mxu1 }
 0x580   : > { %v1423_v44 = vpop.f32.mrb[25].mxu1 }
 0x581   : > { %v2876_v38 = vpop.f32.mrb[26].mxu1 }
 0x582   : > { %v1489_v6 = vpack.c.bf16 %v2876_v38, %v2875_v5  ;;  %v1426_v40 = vpop.f32.mrb[27].mxu1  ;;  %v1737_v38 = vld [vmem:[#allocation8 + $0x40] sm:$0xff] }
 0x583   : > { %v1487_v9 = vpack.c.bf16 %v1426_v40, %v1423_v44  ;;  %v1729_v40 = vld [vmem:[#allocation7 + $0x48] sm:$0xff] }
 0x584   : > { %v1738_v44 = vld [vmem:[#allocation8 + $0x48] sm:$0xff] }
 0x585   : > { %1686 = vmatprep.mubr.bf16.mxu1 %v1487_v9 }
 0x586   : > { %1687 = vmatmul.mubr.bf16.vlgmr.msra.gmra.mrb[32].mxu1 %v1486_v7 }
 0x587   : > { %1696 = vmatprep.mubr.bf16.mxu1 %v1489_v6  ;;  %v2879_v0 = vpop.f32.mrb[28].mxu1 }
 0x588   : > { %v1439_v4 = vpop.f32.mrb[29].mxu1 }
 0x589   : > { %v2880_v48 = vpop.f32.mrb[30].mxu1 }
 0x58a   : > { %v1493_v20 = vpack.c.bf16 %v2880_v48, %v2879_v0  ;;  %v1442_v17 = vpop.f32.mrb[31].mxu1 }
 0x58b   : > { %v1491_v49 = vpack.c.bf16 %v1442_v17, %v1439_v4 }
 0x58e   : > { %1697 = vmatmul.mubr.bf16.gmra.mrb[36].mxu1 %v1488_v11 }
 0x58f   : > { %1706 = vmatprep.mubr.bf16.mxu1 %v1491_v49  ;;  %v1730_v49 = vld [vmem:[#allocation7 + $0x50] sm:$0xff] }
 0x596   : > { %1707 = vmatmul.mubr.bf16.gmra.mrb[40].mxu1 %v1490_v50 }
 0x597   : > { %1716 = vmatprep.mubr.bf16.mxu1 %v1493_v20 }
 0x59e   : > { %1717 = vmatmul.mubr.bf16.gmra.mrb[44].mxu1 %v1492_v47 }
 0x59f   : > { %2929 = vmatprep.mubr.bf16.mxu1 %v4331_v59 }
 0x659   : > { %v1688_v5 = vpop.f32.mrb[32].mxu1 }
 0x65a   : > { %v1745_v46 = vmul.f32 %v1728_v39, %v1688_v5  ;;  %v1769_v6 = vmul.f32 %v1737_v38, %v1688_v5  ;;  %v1690_v43 = vpop.f32.mrb[33].mxu1 }
 0x65b   : > { %v1753_v45 = vmul.f32 %v1737_v38, %v1690_v43  ;;  %v1777_v7 = vmul.f32 %v1728_v39, %v1690_v43  ;;  %v1692_v0 = vpop.f32.mrb[34].mxu1 }
 0x65c   : > { %v1746_v9 = vmul.f32 %v1729_v40, %v1692_v0  ;;  %v1770_v4 = vmul.f32 %v1738_v44, %v1692_v0  ;;  %v1694_v11 = vpop.f32.mrb[35].mxu1 }
 0x65d   : > { %v1761_v48 = vsub.f32 %v1745_v46, %v1753_v45  ;;  %v1785_v50 = vadd.f32 %v1777_v7, %v1769_v6  ;;  %v1754_v20 = vmul.f32 %v1738_v44, %v1694_v11  ;;  %v1778_v47 = vmul.f32 %v1729_v40, %v1694_v11 }
 0x65f   : > { %v1762_v17 = vsub.f32 %v1746_v9, %v1754_v20  ;;  %v1786_v59 = vadd.f32 %v1778_v47, %v1770_v4  ;;  %v1733_v47 = vld [vmem:[#allocation7 + $0x68] sm:$0xff] }
 0x661   : > { %v1698_v36 = vpop.f32.mrb[36].mxu1  ;;  %v1793_v37 = vpack.c.bf16 %v1762_v17, %v1761_v48  ;;  %v4520_v5 = vpack.c.bf16 %v1786_v59, %v1785_v50  ;;  %v1732_v48 = vld [vmem:[#allocation7 + $0x60] sm:$0xff] }
 0x662   : > { %v1747_v38 = vmul.f32 %v1730_v49, %v1698_v36  ;;  %v1771_v39 = vmul.f32 %v1739_v13, %v1698_v36  ;;  %v1700_v43 = vpop.f32.mrb[37].mxu1  ;;  %v1741_v50 = vld [vmem:[#allocation8 + $0x60] sm:$0xff]  ;;  %v1742_v36 = vld [vmem:[#allocation8 + $0x68] sm:$0xff] }
 0x663   : > { %v1755_v35 = vmul.f32 %v1739_v13, %v1700_v43  ;;  %v1779_v0 = vmul.f32 %v1730_v49, %v1700_v43  ;;  %v1702_v34 = vpop.f32.mrb[38].mxu1  ;;  %2881 = vmatprep.subr.bf16.mxu0 %v1793_v37 }
 0x664   : > { %v1748_v46 = vmul.f32 %v1731_v14, %v1702_v34  ;;  %v1772_v44 = vmul.f32 %v1740_v10, %v1702_v34  ;;  %v1704_v40 = vpop.f32.mrb[39].mxu1  ;;  %2882 = vmatpush3.bf16.msra.mxu0 %v1793_v37 }
 0x665   : > { %v1763_v6 = vsub.f32 %v1747_v38, %v1755_v35  ;;  %v1787_v45 = vadd.f32 %v1779_v0, %v1771_v39  ;;  %v1756_v7 = vmul.f32 %v1740_v10, %v1704_v40  ;;  %v1780_v9 = vmul.f32 %v1731_v14, %v1704_v40  ;;  %v1734_v40 = vld [vmem:[#allocation7 + $0x70] sm:$0xff] }
 0x667   : > { %v1764_v4 = vsub.f32 %v1748_v46, %v1756_v7  ;;  %v1788_v11 = vadd.f32 %v1780_v9, %v1772_v44  ;;  %v1735_v7 = vld [vmem:[#allocation7 + $0x78] sm:$0xff] }
 0x668   : > { %v1744_v9 = vld [vmem:[#allocation8 + $0x78] sm:$0xff] }
 0x669   : > { %v1708_v20 = vpop.f32.mrb[40].mxu1  ;;  %v1794_v17 = vpack.c.bf16 %v1764_v4, %v1763_v6  ;;  %v1798_v13 = vpack.c.bf16 %v1788_v11, %v1787_v45  ;;  %v1743_v6 = vld [vmem:[#allocation8 + $0x70] sm:$0xff] }
 0x66a   : > { %v1749_v59 = vmul.f32 %v1732_v48, %v1708_v20  ;;  %v1773_v49 = vmul.f32 %v1741_v50, %v1708_v20  ;;  %v1710_v43 = vpop.f32.mrb[41].mxu1 }
 0x66b   : > { %v1757_v42 = vmul.f32 %v1741_v50, %v1710_v43  ;;  %v1781_v34 = vmul.f32 %v1732_v48, %v1710_v43  ;;  %v1712_v41 = vpop.f32.mrb[42].mxu1  ;;  %2883 = vmatprep.subr.bf16.mxu0 %v1794_v17 }
 0x66c   : > { %v1750_v35 = vmul.f32 %v1733_v47, %v1712_v41  ;;  %v1774_v37 = vmul.f32 %v1742_v36, %v1712_v41  ;;  %v1714_v10 = vpop.f32.mrb[43].mxu1  ;;  %2884 = vmatpush3.bf16.msra.mxu0 %v1794_v17 }
 0x66d   : > { %v1765_v14 = vsub.f32 %v1749_v59, %v1757_v42  ;;  %v1789_v38 = vadd.f32 %v1781_v34, %v1773_v49  ;;  %v1758_v39 = vmul.f32 %v1742_v36, %v1714_v10  ;;  %v1782_v0 = vmul.f32 %v1733_v47, %v1714_v10 }
 0x66f   : > { %v1766_v46 = vsub.f32 %v1750_v35, %v1758_v39  ;;  %v1790_v44 = vadd.f32 %v1782_v0, %v1774_v37  ;;  %v3267_v39 = vld [vmem:[#allocation14 + $0x14] ss:$8 sps:$4 sm:$0xff]   ;;  %v3268_v0 = vld [vmem:[#allocation14 + $0x10] ss:$8 sps:$4 sm:$0xff]  }
 0x671   : > { %v1718_v45 = vpop.f32.mrb[44].mxu1  ;;  %v1795_v4 = vpack.c.bf16 %v1766_v46, %v1765_v14  ;;  %v1799_v11 = vpack.c.bf16 %v1790_v44, %v1789_v38  ;;  %v3266_v38 = vld [vmem:[#allocation14] ss:$8 sps:$4 sm:$0xff]   ;;  %v3269_v46 = vld [vmem:[#allocation14 + $0x24] ss:$8 sps:$4 sm:$0xff]  }
 0x672   : > { %v1751_v48 = vmul.f32 %v1734_v40, %v1718_v45  ;;  %v1775_v50 = vmul.f32 %v1743_v6, %v1718_v45  ;;  %v1720_v20 = vpop.f32.mrb[45].mxu1  ;;  %v3272_v44 = vld [vmem:[#allocation14 + $0x30] ss:$8 sps:$4 sm:$0xff]  }
 0x673   : > { %v1759_v43 = vmul.f32 %v1743_v6, %v1720_v20  ;;  %v1783_v41 = vmul.f32 %v1734_v40, %v1720_v20  ;;  %v1722_v12 = vpop.f32.mrb[46].mxu1  ;;  %2885 = vmatprep.subr.bf16.mxu0 %v1795_v4  ;;  %v3275_v40 = vld [vmem:[#allocation14 + $0x54] ss:$8 sps:$4 sm:$0xff]  }
 0x674   : > { %v1752_v42 = vmul.f32 %v1735_v7, %v1722_v12  ;;  %v1776_v17 = vmul.f32 %v1744_v9, %v1722_v12  ;;  %v1724_v36 = vpop.f32.mrb[47].mxu1  ;;  %2886 = vmatpush3.bf16.msra.mxu0 %v1795_v4  ;;  %v3265_v12 = vld [vmem:[#allocation14 + $0x4] ss:$8 sps:$4 sm:$0xff]  }
 0x675   : > { %v1767_v47 = vsub.f32 %v1751_v48, %v1759_v43  ;;  %v1791_v59 = vadd.f32 %v1783_v41, %v1775_v50  ;;  %v1760_v49 = vmul.f32 %v1744_v9, %v1724_v36  ;;  %v1784_v34 = vmul.f32 %v1735_v7, %v1724_v36 }
 0x677   : > { %v1768_v35 = vsub.f32 %v1752_v42, %v1760_v49  ;;  %v1792_v37 = vadd.f32 %v1784_v34, %v1776_v17 }
 0x679   : > { %v1796_v10 = vpack.c.bf16 %v1768_v35, %v1767_v47  ;;  %v1800_v14 = vpack.c.bf16 %v1792_v37, %v1791_v59 }
 0x67b   : > { %2887 = vmatprep.subr.bf16.mxu0 %v1796_v10 }
 0x67c   : > { %2888 = vmatpush3.bf16.msra.mxu0 %v1796_v10 }
 0x67d   : > { %2889 = vmatprep.subr.bf16.mxu0 %v4520_v5 }
 0x680   : > { %2890 = vmatpush3.bf16.msra.mxu0 %v4520_v5  ;;  %v3270_v5 = vld [vmem:[#allocation14 + $0x20] ss:$8 sps:$4 sm:$0xff]  }
 0x681   : > { %2891 = vmatprep.subr.bf16.mxu0 %v1798_v13 }
 0x684   : > { %2892 = vmatpush3.bf16.msra.mxu0 %v1798_v13  ;;  %v3271_v13 = vld [vmem:[#allocation14 + $0x34] ss:$8 sps:$4 sm:$0xff]  }
 0x685   : > { %2893 = vmatprep.subr.bf16.mxu0 %v1799_v11 }
 0x688   : > { %2894 = vmatpush3.bf16.msra.mxu0 %v1799_v11 }
 0x689   : > { %2895 = vmatprep.subr.bf16.mxu0 %v1800_v14 }
 0x68c   : > { %2896 = vmatpush3.bf16.msra.mxu0 %v1800_v14 }
 0x68d   : > { %1906 = vmatprep.subr.bf16.mxu0 %v3265_v12  ;;  %v4853_v12 = vld [vmem:[#allocation34_spill] sm:$0xff] }
 0x68f   : > { %2898 = vmatmul.mubr.bf16.vlgmr.msra.gmra.mrb[20].mxu0 %v4279_v15  ;;  %v3273_v15 = vld [vmem:[#allocation14 + $0x44] ss:$8 sps:$4 sm:$0xff]  }
 0x690   : > { %2901 = vmatprep.mubr.bf16.mxu0 %v4281_v16  ;;  %1907 = vmatpush1.bf16.msra.mxu0 %v3266_v38  ;;  %v3274_v16 = vld [vmem:[#allocation14 + $0x40] ss:$8 sps:$4 sm:$0xff]   ;;  %v4854_v38 = vld [vmem:[#allocation35_spill] sm:$0xff] }
 0x691   : > { %1908 = vmatprep.subr.bf16.mxu0 %v3267_v39 }
 0x694   : > { %1909 = vmatpush1.bf16.msra.mxu0 %v3268_v0 }
 0x695   : > { %1910 = vmatprep.subr.bf16.mxu0 %v3269_v46 }
 0x697   : > { %2902 = vmatmul.mubr.bf16.gmra.mrb[24].mxu0 %v4285_v18 }
 0x698   : > { %2905 = vmatprep.mubr.bf16.mxu0 %v4287_v19  ;;  %1911 = vmatpush1.bf16.msra.mxu0 %v3270_v5 }
 0x699   : > { %1912 = vmatprep.subr.bf16.mxu0 %v3271_v13 }
 0x69c   : > { %1913 = vmatpush1.bf16.msra.mxu0 %v3272_v44 }
 0x69d   : > { %1914 = vmatprep.subr.bf16.mxu0 %v3273_v15 }
 0x69f   : > { %2906 = vmatmul.mubr.bf16.gmra.mrb[28].mxu0 %v4291_v21 }
 0x6a0   : > { %2909 = vmatprep.mubr.bf16.mxu0 %v4293_v22  ;;  %1915 = vmatpush1.bf16.msra.mxu0 %v3274_v16 }
 0x6a1   : > { %1916 = vmatprep.subr.bf16.mxu0 %v3275_v40 }
 0x6a4   : > { %1917 = vmatpush1.bf16.msra.mxu0 %v4238_v51 }
 0x6a5   : > { %1918 = vmatprep.subr.bf16.mxu0 %v4240_v52 }
 0x6a7   : > { %2910 = vmatmul.mubr.bf16.gmra.mrb[32].mxu0 %v4297_v23 }
 0x6a8   : > { %1919 = vmatpush1.bf16.msra.mxu0 %v4243_v53 }
 0x6a9   : > { %1920 = vmatprep.subr.bf16.mxu0 %v4246_v54 }
 0x6ac   : > { %1921 = vmatpush1.bf16.msra.mxu0 %v4249_v55 }
 0x6ad   : > { %1922 = vmatprep.subr.bf16.mxu0 %v4252_v56 }
 0x6b0   : > { %1923 = vmatpush1.bf16.msra.mxu0 %v4255_v57 }
 0x6b1   : > { %1924 = vmatprep.subr.bf16.mxu0 %v4258_v58 }
 0x6b4   : > { %1925 = vmatpush1.bf16.msra.mxu0 %v4261_v60 }
 0x6b5   : > { %1926 = vmatprep.subr.bf16.mxu0 %v4264_v62 }
 0x6b8   : > { %1927 = vmatpush1.bf16.msra.mxu0 %v4267_v1 }
 0x6b9   : > { %1928 = vmatprep.subr.bf16.mxu0 %v4302_v25 }
 0x6bc   : > { %1929 = vmatpush1.bf16.msra.mxu0 %v4300_v24 }
 0x6bd   : > { %1930 = vmatprep.subr.bf16.mxu0 %v4304_v26 }
 0x6c0   : > { %1931 = vmatpush1.bf16.msra.mxu0 %v4308_v27 }
 0x6c1   : > { %1932 = vmatprep.subr.bf16.mxu0 %v4314_v29 }
 0x6c4   : > { %1933 = vmatpush1.bf16.msra.mxu0 %v4312_v28 }
 0x6c5   : > { %1934 = vmatprep.subr.bf16.mxu0 %v4316_v30 }
 0x6c8   : > { %1935 = vmatpush1.bf16.msra.mxu0 %v4320_v31 }
 0x6c9   : > { %1936 = vmatprep.subr.bf16.mxu0 %v4326_v33 }
 0x6cc   : > { %1937 = vmatpush1.bf16.msra.mxu0 %v4324_v32 }
 0x762   : > { %v2899_v51 = vpop.f32.mrb[20].mxu0 }
 0x763   : > { %v1835_v52 = vpop.f32.mrb[21].mxu0 }
 0x764   : > { %v2900_v53 = vpop.f32.mrb[22].mxu0 }
 0x765   : > { %v1900_v54 = vpack.c.bf16 %v2900_v53, %v2899_v51  ;;  %v1838_v55 = vpop.f32.mrb[23].mxu0  ;;  %v4856_v53 = vld [vmem:[#allocation37_spill] sm:$0xff] }
 0x766   : > { %v1898_v56 = vpack.c.bf16 %v1838_v55, %v1835_v52 }
 0x76a   : > { %v2903_v57 = vpop.f32.mrb[24].mxu0 }
 0x76b   : > { %v1851_v58 = vpop.f32.mrb[25].mxu0 }
 0x76c   : > { %v2904_v60 = vpop.f32.mrb[26].mxu0 }
 0x76d   : > { %v1904_v62 = vpack.c.bf16 %v2904_v60, %v2903_v57  ;;  %v1854_v1 = vpop.f32.mrb[27].mxu0  ;;  %v4857_v60 = vld [vmem:[#allocation38_spill] sm:$0xff] }
 0x76e   : > { %v1902_v18 = vpack.c.bf16 %v1854_v1, %v1851_v58  ;;  %v4858_v1 = vld [vmem:[#allocation39_spill] sm:$0xff] }
 0x772   : > { %v2907_v19 = vpop.f32.mrb[28].mxu0 }
 0x773   : > { %v1867_v21 = vpop.f32.mrb[29].mxu0 }
 0x774   : > { %v2908_v22 = vpop.f32.mrb[30].mxu0 }
 0x775   : > { %v1901_v23 = vpack.c.bf16 %v2908_v22, %v2907_v19  ;;  %v1870_v24 = vpop.f32.mrb[31].mxu0 }
 0x776   : > { %v1899_v25 = vpack.c.bf16 %v1870_v24, %v1867_v21 }
 0x778   : > { %1938 = vmatprep.mubr.bf16.mxu0 %v1899_v25 }
 0x779   : > { %1939 = vmatmul.mubr.bf16.vlgmr.msra.gmra.mrb[36].mxu0 %v1898_v56 }
 0x77a   : > { %1948 = vmatprep.mubr.bf16.mxu0 %v1901_v23  ;;  %v2911_v26 = vpop.f32.mrb[32].mxu0 }
 0x77b   : > { %v1883_v27 = vpop.f32.mrb[33].mxu0 }
 0x77c   : > { %v2912_v28 = vpop.f32.mrb[34].mxu0 }
 0x77d   : > { %v1905_v29 = vpack.c.bf16 %v2912_v28, %v2911_v26  ;;  %v1886_v30 = vpop.f32.mrb[35].mxu0 }
 0x77e   : > { %v1903_v31 = vpack.c.bf16 %v1886_v30, %v1883_v27  ;;  %v4859_v30 = vld [vmem:[#allocation40_spill] sm:$0xff] }
 0x781   : > { %1949 = vmatmul.mubr.bf16.gmra.mrb[40].mxu0 %v1900_v54 }
 0x782   : > { %1958 = vmatprep.mubr.bf16.mxu0 %v1903_v31 }
 0x789   : > { %1959 = vmatmul.mubr.bf16.gmra.mrb[44].mxu0 %v1902_v18 }
 0x78a   : > { %1968 = vmatprep.mubr.bf16.mxu0 %v1905_v29 }
 0x791   : > { %1969 = vmatmul.mubr.bf16.gmra.mrb[48].mxu0 %v1904_v62 }
 0x84c   : > { %v1940_v32 = vpop.f32.mrb[36].mxu0 }
 0x84d   : > { %v1979_v33 = vmul.f32 %v1940_v32, %v4334_v61  ;;  %v2003_v6 = vmul.f32 %v1940_v32, %v4336_v63  ;;  %v1942_v45 = vpop.f32.mrb[37].mxu0  ;;  %v4860_v32 = vld [vmem:[#allocation41_spill] sm:$0xff] }
 0x84e   : > { %v1987_v7 = vmul.f32 %v1942_v45, %v4336_v63  ;;  %v2011_v9 = vmul.f32 %v1942_v45, %v4334_v61  ;;  %v1944_v4 = vpop.f32.mrb[38].mxu0  ;;  %v4852_v61 = vld [vmem:[#allocation33_spill] sm:$0xff] }
 0x84f   : > { %v1980_v11 = vmul.f32 %v1944_v4, %v4338_v2  ;;  %v2004_v48 = vmul.f32 %v1944_v4, %v4340_v3  ;;  %v1946_v50 = vpop.f32.mrb[39].mxu0  ;;  %v4861_v4 = vld [vmem:[#allocation42_spill] sm:$0xff] }
 0x850   : > { %v1995_v20 = vsub.f32 %v1979_v33, %v1987_v7  ;;  %v2019_v43 = vadd.f32 %v2011_v9, %v2003_v6  ;;  %v1988_v41 = vmul.f32 %v1946_v50, %v4340_v3  ;;  %v2012_v42 = vmul.f32 %v1946_v50, %v4338_v2 }
 0x852   : > { %v1996_v17 = vsub.f32 %v1980_v11, %v1988_v41  ;;  %v2020_v36 = vadd.f32 %v2012_v42, %v2004_v48  ;;  %v4862_v48 = vld [vmem:[#allocation43_spill] sm:$0xff] }
 0x854   : > { %v1950_v47 = vpop.f32.mrb[40].mxu0  ;;  %v2027_v59 = vpack.c.bf16 %v1996_v17, %v1995_v20  ;;  %v2031_v49 = vpack.c.bf16 %v2020_v36, %v2019_v43 }
 0x855   : > { %v1981_v63 = vmul.f32 %v1950_v47, %v4350_v8  ;;  %v2005_v34 = vmul.f32 %v1950_v47, %v4852_v61  ;;  %v1952_v35 = vpop.f32.mrb[41].mxu0 }
 0x856   : > { %v1989_v37 = vmul.f32 %v1952_v35, %v4852_v61  ;;  %v2013_v10 = vmul.f32 %v1952_v35, %v4350_v8  ;;  %v1954_v14 = vpop.f32.mrb[42].mxu0  ;;  %2913 = vmatprep.subr.bf16.mxu1 %v2027_v59  ;;  %v4855_v8 = vld [vmem:[#allocation36_spill] sm:$0xff]  ;;  %v4865_v35 = vld [vmem:[#allocation46_spill] sm:$0xff] }
 0x857   : > { %v1982_v3 = vmul.f32 %v1954_v14, %v4853_v12  ;;  %v2006_v2 = vmul.f32 %v1954_v14, %v4854_v38  ;;  %v1956_v39 = vpop.f32.mrb[43].mxu0  ;;  %2914 = vmatpush3.bf16.msra.mxu1 %v2027_v59  ;;  %v4863_v61 = vld [vmem:[#allocation44_spill] sm:$0xff]  ;;  %v4868_v14 = vld [vmem:[#allocation49_spill] sm:$0xff] }
 0x858   : > { %v1997_v0 = vsub.f32 %v1981_v63, %v1989_v37  ;;  %v2021_v46 = vadd.f32 %v2013_v10, %v2005_v34  ;;  %v1990_v5 = vmul.f32 %v1956_v39, %v4854_v38  ;;  %v2014_v13 = vmul.f32 %v1956_v39, %v4853_v12  ;;  %v4864_v34 = vld [vmem:[#allocation45_spill] sm:$0xff]  ;;  %v4866_v37 = vld [vmem:[#allocation47_spill] sm:$0xff]  ;;  %v4867_v10 = vld [vmem:[#allocation48_spill] sm:$0xff] }
 0x859   : > { %v4869_v12 = vld [vmem:[#allocation50_spill] sm:$0xff]  ;;  %v4872_v38 = vld [vmem:[#allocation53_spill] sm:$0xff]  ;;  %v4874_v39 = vld [vmem:[#allocation55_spill] sm:$0xff] }
 0x85a   : > { %v1998_v44 = vsub.f32 %v1982_v3, %v1990_v5  ;;  %v2022_v15 = vadd.f32 %v2014_v13, %v2006_v2  ;;  %v4871_v3 = vld [vmem:[#allocation52_spill] sm:$0xff]  ;;  %v4873_v2 = vld [vmem:[#allocation54_spill] sm:$0xff]  ;;  %v4878_v13 = vld [vmem:[#allocation59_spill] sm:$0xff] }
 0x85b   : > { %v4877_v5 = vld [vmem:[#allocation58_spill] sm:$0xff] }
 0x85c   : > { %v1960_v16 = vpop.f32.mrb[44].mxu0  ;;  %v2028_v40 = vpack.c.bf16 %v1998_v44, %v1997_v0  ;;  %v2032_v51 = vpack.c.bf16 %v2022_v15, %v2021_v46  ;;  %v4875_v0 = vld [vmem:[#allocation56_spill] sm:$0xff]  ;;  %v4876_v46 = vld [vmem:[#allocation57_spill] sm:$0xff] }
 0x85d   : > { %v1983_v52 = vmul.f32 %v1960_v16, %v4855_v8  ;;  %v2007_v54 = vmul.f32 %v1960_v16, %v4856_v53  ;;  %v1962_v55 = vpop.f32.mrb[45].mxu0  ;;  %v4879_v44 = vld [vmem:[#allocation60_spill] sm:$0xff]  ;;  %v4880_v15 = vld [vmem:[#allocation61_spill] sm:$0xff]  ;;  %v4881_v16 = vld [vmem:[#allocation62_spill] sm:$0xff] }
 0x85e   : > { %v1991_v56 = vmul.f32 %v1962_v55, %v4856_v53  ;;  %v2015_v57 = vmul.f32 %v1962_v55, %v4855_v8  ;;  %v1964_v58 = vpop.f32.mrb[46].mxu0  ;;  %2915 = vmatprep.subr.bf16.mxu1 %v2028_v40  ;;  %v4884_v8 = vld [vmem:[#allocation65_spill] sm:$0xff]  ;;  %v4886_v53 = vld [vmem:[#allocation67_spill] sm:$0xff] }
 0x85f   : > { %v1984_v62 = vmul.f32 %v1964_v58, %v4857_v60  ;;  %v2008_v18 = vmul.f32 %v1964_v58, %v4858_v1  ;;  %v1966_v19 = vpop.f32.mrb[47].mxu0  ;;  %2916 = vmatpush3.bf16.msra.mxu1 %v2028_v40  ;;  %v4882_v40 = vld [vmem:[#allocation63_spill] sm:$0xff]  ;;  %v4888_v55 = vld [vmem:[#allocation69_spill] sm:$0xff]  ;;  %v4891_v58 = vld [vmem:[#allocation72_spill] sm:$0xff] }
 0x860   : > { %v1999_v21 = vsub.f32 %v1983_v52, %v1991_v56  ;;  %v2023_v22 = vadd.f32 %v2015_v57, %v2007_v54  ;;  %v1992_v23 = vmul.f32 %v1966_v19, %v4858_v1  ;;  %v2016_v24 = vmul.f32 %v1966_v19, %v4857_v60  ;;  %v4885_v52 = vld [vmem:[#allocation66_spill] sm:$0xff]  ;;  %v4887_v54 = vld [vmem:[#allocation68_spill] sm:$0xff]  ;;  %v4890_v57 = vld [vmem:[#allocation71_spill] sm:$0xff] }
 0x861   : > { %v4889_v56 = vld [vmem:[#allocation70_spill] sm:$0xff]  ;;  %v4894_v1 = vld [vmem:[#allocation75_spill] sm:$0xff] }
 0x862   : > { %v2000_v25 = vsub.f32 %v1984_v62, %v1992_v23  ;;  %v2024_v26 = vadd.f32 %v2016_v24, %v2008_v18  ;;  %v4892_v60 = vld [vmem:[#allocation74_spill] sm:$0xff]  ;;  %v4893_v62 = vld [vmem:[#allocation73_spill] sm:$0xff]  ;;  %v4895_v18 = vld [vmem:[#allocation76_spill] sm:$0xff] }
 0x863   : > { %v4896_v19 = vld [vmem:[#allocation78_spill] sm:$0xff]  ;;  %v4899_v23 = vld [vmem:[#allocation80_spill] sm:$0xff] }
 0x864   : > { %v1970_v27 = vpop.f32.mrb[48].mxu0  ;;  %v2029_v28 = vpack.c.bf16 %v2000_v25, %v1999_v21  ;;  %v2033_v29 = vpack.c.bf16 %v2024_v26, %v2023_v22  ;;  %v4897_v21 = vld [vmem:[#allocation77_spill] sm:$0xff]  ;;  %v4898_v22 = vld [vmem:[#allocation79_spill] sm:$0xff]  ;;  %v4900_v24 = vld [vmem:[#allocation82_spill] sm:$0xff] }
 0x865   : > { %v1985_v31 = vmul.f32 %v1970_v27, %v4859_v30  ;;  %v2009_v33 = vmul.f32 %v1970_v27, %v4860_v32  ;;  %v1972_v6 = vpop.f32.mrb[49].mxu0  ;;  %v4901_v25 = vld [vmem:[#allocation81_spill] sm:$0xff] }
 0x866   : > { %v1993_v45 = vmul.f32 %v1972_v6, %v4860_v32  ;;  %v2017_v7 = vmul.f32 %v1972_v6, %v4859_v30  ;;  %v1974_v9 = vpop.f32.mrb[50].mxu0  ;;  %2917 = vmatprep.subr.bf16.mxu1 %v2029_v28  ;;  %v3253_v26 = vld [vmem:[#allocation19] sm:$0xff]   ;;  %v3254_v27 = vld [vmem:[#allocation19 + $0x8] sm:$0xff]  }
 0x867   : > { %v1986_v11 = vmul.f32 %v1974_v9, %v4861_v4  ;;  %v2010_v50 = vmul.f32 %v1974_v9, %v4862_v48  ;;  %v1976_v20 = vpop.f32.mrb[51].mxu0  ;;  %2918 = vmatpush3.bf16.msra.mxu1 %v2029_v28  ;;  %2945 = vmatprep.subr.bf16.mxu0 %v3253_v26  ;;  %v3255_v28 = vld [vmem:[#allocation19 + $0x10] sm:$0xff]  }
 0x868   : > { %v2001_v43 = vsub.f32 %v1985_v31, %v1993_v45  ;;  %v2025_v41 = vadd.f32 %v2017_v7, %v2009_v33  ;;  %v1994_v42 = vmul.f32 %v1976_v20, %v4862_v48  ;;  %v2018_v17 = vmul.f32 %v1976_v20, %v4861_v4  ;;  %2946 = vmatpush3.bf16.msra.mxu0 %v3253_v26 }
 0x869   : > { %2947 = vmatprep.subr.bf16.mxu0 %v3254_v27 }
 0x86a   : > { %v2002_v36 = vsub.f32 %v1986_v11, %v1994_v42  ;;  %v2026_v47 = vadd.f32 %v2018_v17, %v2010_v50 }
 0x86c   : > { %v2030_v59 = vpack.c.bf16 %v2002_v36, %v2001_v43  ;;  %v2034_v63 = vpack.c.bf16 %v2026_v47, %v2025_v41  ;;  %2948 = vmatpush3.bf16.msra.mxu0 %v3254_v27 }
 0x86d   : > { %2949 = vmatprep.subr.bf16.mxu0 %v3255_v28 }
 0x86e   : > { %2919 = vmatprep.subr.bf16.mxu1 %v2030_v59 }
 0x86f   : > { %2920 = vmatpush3.bf16.msra.mxu1 %v2030_v59 }
 0x870   : > { %2921 = vmatprep.subr.bf16.mxu1 %v2031_v49  ;;  %2950 = vmatpush3.bf16.msra.mxu0 %v3255_v28 }
 0x873   : > { %2922 = vmatpush3.bf16.msra.mxu1 %v2031_v49  ;;  %v4870_v49 = vld [vmem:[#allocation51_spill] sm:$0xff] }
 0x874   : > { %2923 = vmatprep.subr.bf16.mxu1 %v2032_v51 }
 0x877   : > { %2924 = vmatpush3.bf16.msra.mxu1 %v2032_v51  ;;  %v4883_v51 = vld [vmem:[#allocation64_spill] sm:$0xff] }
 0x878   : > { %2925 = vmatprep.subr.bf16.mxu1 %v2033_v29 }
 0x87b   : > { %2926 = vmatpush3.bf16.msra.mxu1 %v2033_v29  ;;  %v3256_v29 = vld [vmem:[#allocation19 + $0x18] sm:$0xff]  }
 0x87c   : > { %2927 = vmatprep.subr.bf16.mxu1 %v2034_v63  ;;  %2951 = vmatprep.subr.bf16.mxu0 %v3256_v29 }
 0x87d   : > { %2952 = vmatpush3.bf16.msra.mxu0 %v3256_v29 }
 0x87f   : > { %2928 = vmatpush3.bf16.msra.mxu1 %v2034_v63 }
 0x880   : > { %2140 = vmatprep.subr.bf16.mxu1 %v4863_v61 }
 0x882   : > { %2930 = vmatmul.mubr.bf16.vlgmr.msra.gmra.mrb[48].mxu1 %v4864_v34 }
 0x883   : > { %2933 = vmatprep.mubr.bf16.mxu1 %v4865_v35  ;;  %2141 = vmatpush1.bf16.msra.mxu1 %v4866_v37  ;;  %v3257_v37 = vld [vmem:[#allocation19 + $0x20] sm:$0xff]  }
 0x884   : > { %2142 = vmatprep.subr.bf16.mxu1 %v4867_v10  ;;  %2953 = vmatprep.subr.bf16.mxu0 %v3257_v37  ;;  %v3258_v10 = vld [vmem:[#allocation19 + $0x28] sm:$0xff]  }
 0x885   : > { %2954 = vmatpush3.bf16.msra.mxu0 %v3257_v37 }
 0x886   : > { %2955 = vmatprep.subr.bf16.mxu0 %v3258_v10 }
 0x887   : > { %2143 = vmatpush1.bf16.msra.mxu1 %v4868_v14  ;;  %v3259_v14 = vld [vmem:[#allocation19 + $0x30] sm:$0xff]  }
 0x888   : > { %2144 = vmatprep.subr.bf16.mxu1 %v4869_v12  ;;  %v3260_v12 = vld [vmem:[#allocation19 + $0x38] sm:$0xff]  }
 0x889   : > { %2956 = vmatpush3.bf16.msra.mxu0 %v3258_v10 }
 0x88a   : > { %2934 = vmatmul.mubr.bf16.gmra.mrb[52].mxu1 %v4870_v49  ;;  %2957 = vmatprep.subr.bf16.mxu0 %v3259_v14 }
 0x88b   : > { %2937 = vmatprep.mubr.bf16.mxu1 %v4871_v3  ;;  %2145 = vmatpush1.bf16.msra.mxu1 %v4872_v38 }
 0x88c   : > { %2146 = vmatprep.subr.bf16.mxu1 %v4873_v2 }
 0x88d   : > { %2958 = vmatpush3.bf16.msra.mxu0 %v3259_v14  ;;  %v2375_v14 = vld [vmem:[#allocation20 + $0x28] sm:$0xff] }
 0x88e   : > { %2959 = vmatprep.subr.bf16.mxu0 %v3260_v12 }
 0x88f   : > { %2147 = vmatpush1.bf16.msra.mxu1 %v4874_v39 }
 0x890   : > { %2148 = vmatprep.subr.bf16.mxu1 %v4875_v0 }
 0x891   : > { %2960 = vmatpush3.bf16.msra.mxu0 %v3260_v12 }
 0x892   : > { %2938 = vmatmul.mubr.bf16.gmra.mrb[56].mxu1 %v4876_v46 }
 0x893   : > { %2941 = vmatprep.mubr.bf16.mxu1 %v4877_v5  ;;  %2149 = vmatpush1.bf16.msra.mxu1 %v4878_v13 }
 0x894   : > { %2150 = vmatprep.subr.bf16.mxu1 %v4879_v44 }
 0x897   : > { %2151 = vmatpush1.bf16.msra.mxu1 %v4880_v15 }
 0x898   : > { %2152 = vmatprep.subr.bf16.mxu1 %v4881_v16 }
 0x89a   : > { %2942 = vmatmul.mubr.bf16.gmra.mrb[60].mxu1 %v4882_v40 }
 0x89b   : > { %2153 = vmatpush1.bf16.msra.mxu1 %v4883_v51 }
 0x89c   : > { %2154 = vmatprep.subr.bf16.mxu1 %v4884_v8 }
 0x89f   : > { %2155 = vmatpush1.bf16.msra.mxu1 %v4885_v52 }
 0x8a0   : > { %2156 = vmatprep.subr.bf16.mxu1 %v4886_v53 }
 0x8a3   : > { %2157 = vmatpush1.bf16.msra.mxu1 %v4887_v54 }
 0x8a4   : > { %2158 = vmatprep.subr.bf16.mxu1 %v4888_v55 }
 0x8a7   : > { %2159 = vmatpush1.bf16.msra.mxu1 %v4889_v56 }
 0x8a8   : > { %2160 = vmatprep.subr.bf16.mxu1 %v4890_v57 }
 0x8ab   : > { %2161 = vmatpush1.bf16.msra.mxu1 %v4891_v58 }
 0x8ac   : > { %2162 = vmatprep.subr.bf16.mxu1 %v4892_v60 }
 0x8af   : > { %2163 = vmatpush1.bf16.msra.mxu1 %v4893_v62 }
 0x8b0   : > { %2164 = vmatprep.subr.bf16.mxu1 %v4894_v1 }
 0x8b3   : > { %2165 = vmatpush1.bf16.msra.mxu1 %v4895_v18 }
 0x8b4   : > { %2166 = vmatprep.subr.bf16.mxu1 %v4896_v19 }
 0x8b7   : > { %2167 = vmatpush1.bf16.msra.mxu1 %v4897_v21 }
 0x8b8   : > { %2168 = vmatprep.subr.bf16.mxu1 %v4898_v22 }
 0x8bb   : > { %2169 = vmatpush1.bf16.msra.mxu1 %v4899_v23 }
 0x8bc   : > { %2170 = vmatprep.subr.bf16.mxu1 %v4900_v24 }
 0x8bf   : > { %2171 = vmatpush1.bf16.msra.mxu1 %v4901_v25 }
 0x955   : > { %v2931_v30 = vpop.f32.mrb[48].mxu1 }
 0x956   : > { %v2069_v31 = vpop.f32.mrb[49].mxu1 }
 0x957   : > { %v2932_v32 = vpop.f32.mrb[50].mxu1 }
 0x958   : > { %v2134_v33 = vpack.c.bf16 %v2932_v32, %v2931_v30  ;;  %v2072_v6 = vpop.f32.mrb[51].mxu1 }
 0x959   : > { %v2132_v45 = vpack.c.bf16 %v2072_v6, %v2069_v31 }
 0x95d   : > { %v2935_v7 = vpop.f32.mrb[52].mxu1 }
 0x95e   : > { %v2085_v9 = vpop.f32.mrb[53].mxu1 }
 0x95f   : > { %v2936_v4 = vpop.f32.mrb[54].mxu1 }
 0x960   : > { %v2138_v11 = vpack.c.bf16 %v2936_v4, %v2935_v7  ;;  %v2088_v48 = vpop.f32.mrb[55].mxu1 }
 0x961   : > { %v2136_v50 = vpack.c.bf16 %v2088_v48, %v2085_v9  ;;  %v2370_v48 = vld [vmem:[#allocation20] sm:$0xff] }
 0x965   : > { %v2939_v20 = vpop.f32.mrb[56].mxu1 }
 0x966   : > { %v2101_v43 = vpop.f32.mrb[57].mxu1 }
 0x967   : > { %v2940_v41 = vpop.f32.mrb[58].mxu1 }
 0x968   : > { %v2135_v42 = vpack.c.bf16 %v2940_v41, %v2939_v20  ;;  %v2104_v17 = vpop.f32.mrb[59].mxu1 }
 0x969   : > { %v2133_v36 = vpack.c.bf16 %v2104_v17, %v2101_v43  ;;  %v2372_v43 = vld [vmem:[#allocation20 + $0x10] sm:$0xff] }
 0x96b   : > { %2172 = vmatprep.mubr.bf16.mxu1 %v2133_v36  ;;  %v2373_v36 = vld [vmem:[#allocation20 + $0x18] sm:$0xff] }
 0x96c   : > { %2173 = vmatmul.mubr.bf16.vlgmr.msra.gmra.mrb[64].mxu1 %v2132_v45 }
 0x96d   : > { %2182 = vmatprep.mubr.bf16.mxu1 %v2135_v42  ;;  %v2943_v47 = vpop.f32.mrb[60].mxu1 }
 0x96e   : > { %v2117_v59 = vpop.f32.mrb[61].mxu1 }
 0x96f   : > { %v2944_v63 = vpop.f32.mrb[62].mxu1 }
 0x970   : > { %v2139_v61 = vpack.c.bf16 %v2944_v63, %v2943_v47  ;;  %v2120_v34 = vpop.f32.mrb[63].mxu1 }
 0x971   : > { %v2137_v35 = vpack.c.bf16 %v2120_v34, %v2117_v59 }
 0x974   : > { %2183 = vmatmul.mubr.bf16.gmra.mrb[68].mxu1 %v2134_v33 }
 0x975   : > { %2192 = vmatprep.mubr.bf16.mxu1 %v2137_v35  ;;  %v2374_v35 = vld [vmem:[#allocation20 + $0x20] sm:$0xff] }
 0x97c   : > { %2193 = vmatmul.mubr.bf16.gmra.mrb[72].mxu1 %v2136_v50  ;;  %v2371_v50 = vld [vmem:[#allocation20 + $0x8] sm:$0xff] }
 0x97d   : > { %2202 = vmatprep.mubr.bf16.mxu1 %v2139_v61 }
 0x984   : > { %2203 = vmatmul.mubr.bf16.gmra.mrb[76].mxu1 %v2138_v11 }
 0xa3f   : > { %v2174_v49 = vpop.f32.mrb[64].mxu1 }
 0xa40   : > { %v2213_v3 = vmul.f32 %v2174_v49, %v2174_v49  ;;  %v2176_v38 = vpop.f32.mrb[65].mxu1 }
 0xa41   : > { %v2221_v2 = vmul.f32 %v2176_v38, %v2176_v38  ;;  %v2178_v39 = vpop.f32.mrb[66].mxu1 }
 0xa42   : > { %v2214_v0 = vmul.f32 %v2178_v39, %v2178_v39  ;;  %v2180_v46 = vpop.f32.mrb[67].mxu1 }
 0xa43   : > { %v2229_v5 = vadd.f32 %v2221_v2, %v2213_v3  ;;  %v2222_v13 = vmul.f32 %v2180_v46, %v2180_v46  ;;  %v2376_v3 = vld [vmem:[#allocation20 + $0x30] sm:$0xff] }
 0xa45   : > { %v2230_v44 = vadd.f32 %v2222_v13, %v2214_v0  ;;  %v2377_v0 = vld [vmem:[#allocation20 + $0x38] sm:$0xff] }
 0xa47   : > { %v2184_v15 = vpop.f32.mrb[68].mxu1  ;;  %v2253_v16 = vpack.c.bf16 %v2230_v44, %v2229_v5 }
 0xa48   : > { %v2215_v40 = vmul.f32 %v2184_v15, %v2184_v15  ;;  %v2186_v51 = vpop.f32.mrb[69].mxu1 }
 0xa49   : > { %v2223_v8 = vmul.f32 %v2186_v51, %v2186_v51  ;;  %v2188_v52 = vpop.f32.mrb[70].mxu1  ;;  %2961 = vmatprep.mubr.bf16.mxu0 %v2253_v16 }
 0xa4a   : > { %v2216_v53 = vmul.f32 %v2188_v52, %v2188_v52  ;;  %v2190_v54 = vpop.f32.mrb[71].mxu1 }
 0xa4b   : > { %v2231_v55 = vadd.f32 %v2223_v8, %v2215_v40  ;;  %v2224_v56 = vmul.f32 %v2190_v54, %v2190_v54 }
 0xa4d   : > { %v2232_v57 = vadd.f32 %v2224_v56, %v2216_v53 }
 0xa4f   : > { %v2254_v58 = vpack.c.bf16 %v2232_v57, %v2231_v55  ;;  %v2194_v60 = vpop.f32.mrb[72].mxu1 }
 0xa50   : > { %v2217_v62 = vmul.f32 %v2194_v60, %v2194_v60  ;;  %v2196_v1 = vpop.f32.mrb[73].mxu1 }
 0xa51   : > { %v2225_v18 = vmul.f32 %v2196_v1, %v2196_v1  ;;  %v2198_v19 = vpop.f32.mrb[74].mxu1  ;;  %2962 = vmatmul.mubr.bf16.vlgmr.msra.gmra.mrb[52].mxu0 %v2254_v58 }
 0xa52   : > { %v2218_v21 = vmul.f32 %v2198_v19, %v2198_v19  ;;  %v2200_v22 = vpop.f32.mrb[75].mxu1 }
 0xa53   : > { %v2233_v23 = vadd.f32 %v2225_v18, %v2217_v62  ;;  %v2226_v24 = vmul.f32 %v2200_v22, %v2200_v22 }
 0xa55   : > { %v2234_v25 = vadd.f32 %v2226_v24, %v2218_v21 }
 0xa57   : > { %v2204_v26 = vpop.f32.mrb[76].mxu1  ;;  %v2255_v27 = vpack.c.bf16 %v2234_v25, %v2233_v23 }
 0xa58   : > { %v2219_v28 = vmul.f32 %v2204_v26, %v2204_v26  ;;  %v2206_v29 = vpop.f32.mrb[77].mxu1 }
 0xa59   : > { %v2227_v30 = vmul.f32 %v2206_v29, %v2206_v29  ;;  %v2208_v31 = vpop.f32.mrb[78].mxu1  ;;  %2965 = vmatprep.mubr.bf16.mxu0 %v2255_v27 }
 0xa5a   : > { %v2220_v32 = vmul.f32 %v2208_v31, %v2208_v31  ;;  %v2210_v33 = vpop.f32.mrb[79].mxu1 }
 0xa5b   : > { %v2235_v6 = vadd.f32 %v2227_v30, %v2219_v28  ;;  %v2228_v45 = vmul.f32 %v2210_v33, %v2210_v33 }
 0xa5d   : > { %v2236_v7 = vadd.f32 %v2228_v45, %v2220_v32 }
 0xa5f   : > { %v2256_v9 = vpack.c.bf16 %v2236_v7, %v2235_v6 }
 0xa61   : > { %2966 = vmatmul.mubr.bf16.gmra.mrb[56].mxu0 %v2256_v9 }
 0xb24   : > { %v2963_v4 = vpop.f32.mrb[52].mxu0 }
 0xb25   : > { %v2339_v11 = vpop.f32.mrb[53].mxu0  ;;  %v2380_v47 = vmul.f32 %v2963_v4, %v2372_v43 }
 0xb26   : > { %v2964_v20 = vpop.f32.mrb[54].mxu0  ;;  %v2378_v42 = vmul.f32 %v2370_v48, %v2339_v11 }
 0xb27   : > { %v2342_v41 = vpop.f32.mrb[55].mxu0  ;;  %v2381_v63 = vmul.f32 %v2964_v20, %v2373_v36 }
 0xb28   : > { %v2379_v17 = vmul.f32 %v2371_v50, %v2342_v41 }
 0xb2a   : > { %v2386_v59 = vadd.f32 %v2379_v17, %v2378_v42 }
 0xb2c   : > { %v2387_v61 = vadd.f32 %v2386_v59, %v2380_v47 }
 0xb2e   : > { %v2388_v34 = vadd.f32 %v2387_v61, %v2381_v63 }
 0xb34   : > { %v2967_v37 = vpop.f32.mrb[56].mxu0 }
 0xb35   : > { %v2355_v10 = vpop.f32.mrb[57].mxu0  ;;  %v2384_v46 = vmul.f32 %v2967_v37, %v2376_v3 }
 0xb36   : > { %v2382_v12 = vmul.f32 %v2374_v35, %v2355_v10  ;;  %v2968_v49 = vpop.f32.mrb[58].mxu0 }
 0xb37   : > { %v2358_v38 = vpop.f32.mrb[59].mxu0  ;;  %v2385_v13 = vmul.f32 %v2968_v49, %v2377_v0 }
 0xb38   : > { %v2389_v2 = vadd.f32 %v2388_v34, %v2382_v12  ;;  %v2383_v39 = vmul.f32 %v2375_v14, %v2358_v38 }
 0xb3a   : > { %v2390_v5 = vadd.f32 %v2389_v2, %v2383_v39 }
 0xb3c   : > { %v2391_v44 = vadd.f32 %v2390_v5, %v2384_v46 }
 0xb3e   : > { %v2392_v15 = vadd.f32 %v2391_v44, %v2385_v13 }
 0xb40   : > { %v2393_v16 = vrot.slane %v2392_v15, 4 }
 0xb42   : > { %v2394_v40 = vadd.f32 %v2393_v16, %v2392_v15 }
 0xb44   : > { %v2395_v51 = vrot.slane %v2394_v40, 2 }
 0xb46   : > { %v2396_v8 = vadd.f32 %v2395_v51, %v2394_v40 }
 0xb48   : > { %v2397_v52 = vrot.slane %v2396_v8, 1 }
 0xb4a   : > { %v2398_v53 = vadd.f32 %v2397_v52, %v2396_v8 }
 0xb4c   : > { %2399 = vst [vmem:[%s589_s30] sm:$0x1] %v2398_v53 }
 0xb4d   : > { %3627 = shalt.err (!%p3624_p5)
}
 0xb4e   : > { %s3628_s0 = scalar_lea.hbm %s4628_s26, 16  ;;  %s3632_s30 = scalar_lea.hbm %s4902_s14, 32 }
 0xb4f   : > { %p3629_p2 = scmp.ne.s32.totalorder %s4628_s26, %s3628_s0  ;;  %p3633_p1 = scmp.lt.u32.totalorder %s4628_s26, %s4902_s14 }
 0xb50   : > { %p3634_p11 = scmp.lt.u32.totalorder %s3632_s30, %s3628_s0  ;;  %p3636_p13 = scmp.lt.u32.totalorder %s3628_s0, %s4628_s26 }
 0xb51   : > { %p3630_p7 = pnand %p3629_p2, %p4903_p8 }
 0xb52   : > { %p3635_p12 = por %p3634_p11, %p3633_p1 }
 0xb53   : > { %p3631_p10 = pneg %p3630_p7 }
 0xb54   : > { %p3637_p6 = por %p3636_p13, %p3635_p12 }
 0xb56   : > { %p3638_p9 = pnand %p3637_p6, %p3631_p10 }
 0xb58   : > { %3641 = shalt.err (!%p3638_p9)
}
 0xb59   : > { %3015 = dma.vmem_to_hbm [thread:$0]  (%p4903_p8), %s4630_s15, 16, %s4628_s26, %s2401_s3  }
 0xb5a PF: > { %s2425_s1 = sand.u32 1, %s3692_s21   ;;  %p4904_p4 = scmp.ne.s32.totalorder %s4784_s18, 0 }
 0xb5b   : > { %p4905_p3 = scmp.ge.s32.totalorder %s3704_s24, 2  ;;  %s2426_s19 = scalar_lea.sflag [#allocation4], %s2425_s1 }
 0xb5d   : > { %p3056_p0 = pnand %p4905_p3, %p4904_p4 }
 0xb5f   : > { %3687 = dma.done.wait (!%p3056_p0), %s2426_s19, 16  }
 0xb60   : > { %3689 = vsyncadd (!%p3056_p0), %s2426_s19, 4294967280  ;;  %p31_p5 = scmp.ge.s32.totalorder %s4086_s12, 4   ;;  %s4906_s21 = smov %s3696_s22 }
 0xb61   : > { %s4907_s22 = smov %s3700_s23  ;;  %s4908_s23 = smov %s4098_s16 }
 0xb62   : > { %s4909_s24 = smov %s4086_s12  ;;  %33 = sbr.rel (!%p31_p5) target bundleno = 17 (0x11), region = 159 }
 0xb69   :  { %2430 = vsyncpa [#allocation3], 1 }
 0xb6a   :  { %2432 = vsyncpa [#allocation3 + $0x1], 1 }
 0xb6b   :  { %2433 = vsyncpa [#allocation6], 1 }
 0xb6c   :  { %2434 = vsyncpa [#allocation9], 1 }
 0xb6d   :  { %2435 = vsyncpa [#allocation12], 1 }
 0xb6e   :  { %2436 = vsyncpa [#allocation15], 1 }
 0xb6f   :  { %2437 = vsyncpa [#allocation18], 1 }
 0xb70   :  { %2438 = vsyncpa [#allocation21], 1 }
 0xb71   :  { %2439 = vsyncpa [#allocation4], 1 }
 0xb72   :  { %2441 = vsyncpa [#allocation4 + $0x1], 1 }

</bundles_post_ra>
